<compile_context>
chip_gen: v7x
topology: tpu7x:2x2x1
jax: 0.10.0
libtpu: 0.0.40
codegen_flags: <defaults>
</compile_context>

<pallas_src>
import functools

import numpy as np
import jax
import jax.numpy as jnp
from jax.experimental import pallas as pl
from jax.experimental.pallas import tpu as pltpu

NEG_SLOPE = 0.01  # nn.LeakyReLU default

# Packed-weight slot layout (bf16 weight slabs [DP, DP], f32 biases [DP, 1]).
PREP_W, MSG_W, UPD_W, DAG_W, GLOB_W = 0, 3, 6, 9, 13   # dag uses 4 slots: W1x, W1h, W2, W3
PREP_B, MSG_B, UPD_B, DAG_B, GLOB_B = 0, 3, 6, 9, 12
N_W_SLOTS, N_B_SLOTS = 16, 16

_BF16 = np.dtype(jnp.bfloat16)


def _round_up(n, m):
    return ((n + m - 1) // m) * m


# ------------------------------ kernel body -------------------------------- #

def _leaky(x):
    return jnp.where(x >= 0, x, NEG_SLOPE * x)


def _mlp3(h, w_ref, b_ref, w_base, b_base):
    """Linear->LeakyReLU->Linear->LeakyReLU->Linear on feature-major [DP, n].

    Weights are bf16; activations are cast to bf16 per dot; accumulation f32.
    """
    for k in range(3):
        h = (jnp.dot(w_ref[w_base + k], h.astype(jnp.bfloat16),
                     preferred_element_type=jnp.float32)
             + b_ref[b_base + k])
        if k < 2:
            h = _leaky(h)
    return h


def _encoder_kernel(x_ref, adjc_ref, scat_ref, dmask_ref, src0_ref,
                    segT_ref, obsT_ref, w_ref, b_ref,
                    hnode_ref, hdag_ref, hglob_ref,
                    hinit_sc, *, has_mp):
    lvl = pl.program_id(0)
    n_lvl = pl.num_programs(0)

    # ---- level 0: prep MLP + initial (masked) update, fused ----
    @pl.when(lvl == 0)
    def _prep():
        h_init = _mlp3(x_ref[...], w_ref, b_ref, PREP_W, PREP_B)
        hinit_sc[...] = h_init
        if has_mp:
            # h = 0 everywhere; h[~index_to_mask(edge_index[0])] = mlp_update(h_init)
            hnode_ref[...] = src0_ref[...] * _mlp3(h_init, w_ref, b_ref, UPD_W, UPD_B)
        else:
            # NodeEncoder._forward_no_mp: h_node = mlp_prep(x)
            hnode_ref[...] = h_init

    # ---- one message-passing level (reverse flow), compacted dst columns ----
    if has_mp:
        h = hnode_ref[...]
        # mlp_msg on all node columns (cheap [16,16]@[16,N]); rows of adjC for
        # non-source nodes are all-zero, so no explicit source mask is needed.
        msg = _mlp3(h, w_ref, b_ref, MSG_W, MSG_B)
        # agg over this level's active destination columns only:
        # agg_c[:, k] = sum_src adjC[src, k] * msg[:, src]
        agg_c = jnp.dot(msg.astype(jnp.bfloat16), adjc_ref[...],
                        preferred_element_type=jnp.float32)        # [dp, d_pad]
        upd_c = _mlp3(agg_c, w_ref, b_ref, UPD_W, UPD_B)           # [dp, d_pad]
        # scatter updates back onto node columns (padded slots have zero rows)
        scattered = jnp.dot(upd_c.astype(jnp.bfloat16), scat_ref[...],
                            preferred_element_type=jnp.float32)    # [dp, N]
        upd = hinit_sc[...] + scattered
        # h[dst_mask] = h_init[dst_mask] + mlp_update(agg[dst_mask])
        hnode_ref[...] = h + dmask_ref[...] * (upd - h)

    # ---- last level: DagEncoder + GlobalEncoder, fused ----
    @pl.when(lvl == n_lvl - 1)
    def _finalize():
        h = hnode_ref[...]
        x = x_ref[...]
        # dag MLP first layer on cat([x, h]) == W1x @ x + W1h @ h + b1
        h1 = _leaky(jnp.dot(w_ref[DAG_W], x.astype(jnp.bfloat16),
                            preferred_element_type=jnp.float32)
                    + jnp.dot(w_ref[DAG_W + 1], h.astype(jnp.bfloat16),
                              preferred_element_type=jnp.float32)
                    + b_ref[DAG_B])
        h2 = _leaky(jnp.dot(w_ref[DAG_W + 2], h1.astype(jnp.bfloat16),
                            preferred_element_type=jnp.float32)
                    + b_ref[DAG_B + 1])
        y = (jnp.dot(w_ref[DAG_W + 3], h2.astype(jnp.bfloat16),
                     preferred_element_type=jnp.float32)
             + b_ref[DAG_B + 2])
        # segment_csr(sum) nodes -> dags: y @ onehot^T  (bf16 one-hot)
        h_dag = jnp.dot(y.astype(jnp.bfloat16), segT_ref[...],
                        preferred_element_type=jnp.float32)
        hdag_ref[...] = h_dag
        # GlobalEncoder: mlp, then segment_csr dags -> obs (or global sum)
        z = _mlp3(h_dag, w_ref, b_ref, GLOB_W, GLOB_B)
        hglob_ref[...] = jnp.dot(z.astype(jnp.bfloat16), obsT_ref[...],
                                 preferred_element_type=jnp.float32)


# ----------------------- per-graph structure builder ------------------------ #

def build_graph_structure(num_nodes, edge_index, edge_masks, ptr, obs_ptr=None):
    """Static per-graph structural operands (built once, cache per graph).

    All one-hot / adjacency tensors are converted to bf16 on the host so only
    half-width bytes are transferred and streamed by the kernel.
    """
    n_pad = _round_up(max(num_nodes, 1), 128)
    num_dags = int(len(ptr)) - 1
    s_pad = _round_up(max(num_dags, 1), 128)
    num_glob = (int(len(obs_ptr)) - 1) if obs_ptr is not None else 1
    g_pad = _round_up(max(num_glob, 1), 128)

    n_levels = int(edge_masks.shape[0])
    has_mp = n_levels > 0
    l_eff = max(n_levels, 1)

    ei = np.asarray(edge_index)
    level_edges, level_dst = [], []
    if has_mp:
        for lvl in range(n_levels - 1, -1, -1):          # reversed(edge_masks)
            em = np.asarray(edge_masks[lvl], dtype=bool)
            dst, src = ei[0, em], ei[1, em]              # reverse_flow: i=0 receives
            level_edges.append((src, dst))
            level_dst.append(np.unique(dst))
    d_pad = _round_up(max((len(d) for d in level_dst), default=1), 128)

    adjc = np.zeros((l_eff, n_pad, d_pad), np.float32)   # adjc[l, src, dst_slot]
    scat = np.zeros((l_eff, d_pad, n_pad), np.float32)   # scat[l, dst_slot, dst]
    dmask = np.zeros((l_eff, 1, n_pad), np.float32)      # level dest-node mask
    src0 = np.zeros((1, n_pad), np.float32)              # ~index_to_mask(edge_index[0])
    src0[0, :num_nodes] = 1.0
    if has_mp:
        src0[0, ei[0]] = 0.0
        for out_lvl, ((src, dst), dn) in enumerate(zip(level_edges, level_dst)):
            col = np.searchsorted(dn, dst)               # dst node -> compact column
            adjc[out_lvl, src, col] = 1.0
            scat[out_lvl, np.arange(len(dn)), dn] = 1.0
            dmask[out_lvl, 0, dn] = 1.0

    segT = np.zeros((n_pad, s_pad), np.float32)          # node -> dag one-hot^T
    p = np.asarray(ptr)
    for s in range(num_dags):
        segT[p[s]:p[s + 1], s] = 1.0
    obsT = np.zeros((s_pad, g_pad), np.float32)          # dag -> obs one-hot^T
    if obs_ptr is not None:
        op = np.asarray(obs_ptr)
        for g in range(num_glob):
            obsT[op[g]:op[g + 1], g] = 1.0
    else:
        obsT[:num_dags, 0] = 1.0                         # h_dag.sum(0)[None]

    return {
        "adjc": jnp.asarray(adjc.astype(_BF16)),
        "scat": jnp.asarray(scat.astype(_BF16)),
        "dmask": jnp.asarray(dmask),
        "src0": jnp.asarray(src0),
        "segT": jnp.asarray(segT.astype(_BF16)),
        "obsT": jnp.asarray(obsT.astype(_BF16)),
        "n_pad": n_pad, "d_pad": d_pad, "s_pad": s_pad, "g_pad": g_pad,
        "num_dags": num_dags, "num_glob": num_glob,
        "has_mp": has_mp, "l_eff": l_eff,
    }


# ----------------------------- forward wrapper ------------------------------ #

def encoder_forward(params, x, edge_index, edge_masks, ptr, obs_ptr=None,
                    graph=None):
    """Mirrors EncoderNetwork.forward (reverse_flow=True) with one pallas_call.

    `graph` may be a cached result of build_graph_structure for this graph.
    """
    w_all, b_all = params["w"], params["b"]
    fin = params["num_node_features"]
    embed_dim = params["embed_dim"]
    dp = int(w_all.shape[-1])

    num_nodes = int(x.shape[0])
    if graph is None:
        graph = build_graph_structure(num_nodes, edge_index, edge_masks, ptr, obs_ptr)

    adjc, scat = graph["adjc"], graph["scat"]
    dmask, src0 = graph["dmask"], graph["src0"]
    segT, obsT = graph["segT"], graph["obsT"]
    n_pad, d_pad = graph["n_pad"], graph["d_pad"]
    s_pad, g_pad = graph["s_pad"], graph["g_pad"]
    num_dags, num_glob = graph["num_dags"], graph["num_glob"]
    has_mp, l_eff = graph["has_mp"], graph["l_eff"]

    # feature-major, lane-dense, zero-padded node features  [DP, N_pad]
    x_pad = jnp.zeros((dp, n_pad), jnp.float32).at[:fin, :num_nodes].set(
        jnp.asarray(x, jnp.float32).T)

    # ---- explicit, device-aware VMEM budget (double-buffered blocks) ----
    bf, f4 = 2, 4
    est = (2 * dp * n_pad * f4                       # x
           + 2 * n_pad * d_pad * bf                  # compact adjacency
           + 2 * d_pad * n_pad * bf                  # scatter one-hot
           + 2 * n_pad * f4 + 2 * n_pad * f4         # dmask, src0
           + 2 * n_pad * s_pad * bf                  # segT
           + 2 * s_pad * g_pad * bf                  # obsT
           + 2 * N_W_SLOTS * dp * dp * bf            # weights
           + 2 * N_B_SLOTS * dp * f4                 # biases
           + 2 * dp * n_pad * f4                     # h_node out
           + 2 * dp * s_pad * f4 + 2 * dp * g_pad * f4
           + dp * n_pad * f4)                        # h_init scratch
    try:
        cap = int(pltpu.get_tpu_info().vmem_capacity_bytes) * 3 // 4
    except Exception:
        cap = 48 << 20                               # safe on v5e/v6e/v7x
    vmem_limit = int(min(max(2 * est + (4 << 20), 32 << 20), cap))

    kernel = functools.partial(_encoder_kernel, has_mp=has_mp)

    grid_spec = pltpu.PrefetchScalarGridSpec(
        num_scalar_prefetch=0,
        grid=(l_eff,),
        in_specs=[
            pl.BlockSpec((dp, n_pad), lambda l: (0, 0)),                # x (VMEM-resident)
            pl.BlockSpec((None, n_pad, d_pad), lambda l: (l, 0, 0)),    # compact adj, per level
            pl.BlockSpec((None, d_pad, n_pad), lambda l: (l, 0, 0)),    # scatter one-hot, per level
            pl.BlockSpec((None, 1, n_pad), lambda l: (l, 0, 0)),        # dst mask, per level
            pl.BlockSpec((1, n_pad), lambda l: (0, 0)),                 # initial-update mask
            pl.BlockSpec((n_pad, s_pad), lambda l: (0, 0)),             # node->dag one-hot^T
            pl.BlockSpec((s_pad, g_pad), lambda l: (0, 0)),             # dag->obs one-hot^T
            pl.BlockSpec((N_W_SLOTS, dp, dp), lambda l: (0, 0, 0)),     # packed bf16 weights
            pl.BlockSpec((N_B_SLOTS, dp, 1), lambda l: (0, 0, 0)),      # packed f32 biases
        ],
        out_specs=[
            pl.BlockSpec((dp, n_pad), lambda l: (0, 0)),                # h_node (resident)
            pl.BlockSpec((dp, s_pad), lambda l: (0, 0)),                # h_dag
            pl.BlockSpec((dp, g_pad), lambda l: (0, 0)),                # h_glob
        ],
        scratch_shapes=[pltpu.VMEM((dp, n_pad), jnp.float32)],          # h_init
    )

    out_node, out_dag, out_glob = pl.pallas_call(
        kernel,
        out_shape=(jax.ShapeDtypeStruct((dp, n_pad), jnp.float32),
                   jax.ShapeDtypeStruct((dp, s_pad), jnp.float32),
                   jax.ShapeDtypeStruct((dp, g_pad), jnp.float32)),
        grid_spec=grid_spec,
        compiler_params=pltpu.CompilerParams(
            dimension_semantics=("arbitrary",),      # levels are sequential
            vmem_limit_bytes=vmem_limit),
    )(x_pad, adjc, scat, dmask, src0, segT, obsT, w_all, b_all)

    return {
        "node": out_node[:embed_dim, :num_nodes].T,
        "dag": out_dag[:embed_dim, :num_dags].T,
        "glob": out_glob[:embed_dim, :num_glob].T,
    }


# ----------------------------- parameter setup ------------------------------ #

def _init_mlp(key, in_dim, hid_dims, out_dim):
    """Weights in [out, in] layout (feature-major application W @ h + b)."""
    dims = [in_dim] + list(hid_dims) + [out_dim]
    ws, bs = [], []
    for i in range(len(dims) - 1):
        key, kw, kb = jax.random.split(key, 3)
        ws.append(jax.random.normal(kw, (dims[i + 1], dims[i]), jnp.float32) * 0.1)
        bs.append(jax.random.normal(kb, (dims[i + 1],), jnp.float32) * 0.1)
    return ws, bs


def init_encoder_params(key, num_node_features, embed_dim, hid_dims):
    # dp is a multiple of 16 so bf16 [dp, N] operands are fully sublane-packed.
    dp = _round_up(max(num_node_features, embed_dim, *hid_dims), 16)
    keys = jax.random.split(key, 5)
    prep = _init_mlp(keys[0], num_node_features, hid_dims, embed_dim)
    msg = _init_mlp(keys[1], embed_dim, hid_dims, embed_dim)
    upd = _init_mlp(keys[2], embed_dim, hid_dims, embed_dim)
    dag = _init_mlp(keys[3], num_node_features + embed_dim, hid_dims, embed_dim)
    glob = _init_mlp(keys[4], embed_dim, hid_dims, embed_dim)

    def pad2(a, rows, cols):
        return jnp.pad(a, ((0, rows - a.shape[0]), (0, cols - a.shape[1])))

    w_slabs = [jnp.zeros((dp, dp), jnp.float32)] * N_W_SLOTS
    b_slabs = [jnp.zeros((dp, 1), jnp.float32)] * N_B_SLOTS

    def put(w_base, b_base, mlp):
        ws, bs = mlp
        for k in range(3):
            w_slabs[w_base + k] = pad2(ws[k], dp, dp)
            b_slabs[b_base + k] = pad2(bs[k][:, None], dp, 1)

    put(PREP_W, PREP_B, prep)
    put(MSG_W, MSG_B, msg)
    put(UPD_W, UPD_B, upd)
    put(GLOB_W, GLOB_B, glob)

    # DagEncoder MLP: first layer acts on cat([x, h_node], 1) -> split into W1x / W1h.
    dws, dbs = dag
    w_slabs[DAG_W + 0] = pad2(dws[0][:, :num_node_features], dp, dp)
    w_slabs[DAG_W + 1] = pad2(dws[0][:, num_node_features:], dp, dp)
    w_slabs[DAG_W + 2] = pad2(dws[1], dp, dp)
    w_slabs[DAG_W + 3] = pad2(dws[2], dp, dp)
    for k in range(3):
        b_slabs[DAG_B + k] = pad2(dbs[k][:, None], dp, 1)

    return {"w": jnp.stack(w_slabs).astype(jnp.bfloat16),   # bf16 weight slabs
            "b": jnp.stack(b_slabs),                        # f32 biases
            "num_node_features": num_node_features, "embed_dim": embed_dim}


# ---------------------------------- main ------------------------------------ #

if __name__ == "__main__":
    num_node_features = 5
    embed_dim = 8
    hid_dims = [16, 8]

    key = jax.random.PRNGKey(0)
    k_param, k_x = jax.random.split(key)
    params = init_encoder_params(k_param, num_node_features, embed_dim, hid_dims)

    # Small batched DAG: 2 graphs, 8 nodes total (reverse flow).
    num_nodes = 8
    x = jax.random.normal(k_x, (num_nodes, num_node_features), jnp.float32)
    edge_index = np.array([[0, 1, 2, 2, 5, 6],
                           [2, 2, 3, 4, 6, 7]], dtype=np.int32)
    edge_masks = np.array([[1, 1, 0, 0, 1, 0],     # depth level 0
                           [0, 0, 1, 1, 0, 1]],    # depth level 1
                          dtype=bool)
    ptr = np.array([0, 5, 8], dtype=np.int32)       # node -> dag boundaries
    obs_ptr = np.array([0, 1, 2], dtype=np.int32)   # dag  -> obs boundaries

    # Structure tensors would normally be built once per graph and cached.
    graph = build_graph_structure(num_nodes, edge_index, edge_masks, ptr, obs_ptr)
    h_dict = encoder_forward(params, x, edge_index, edge_masks, ptr, obs_ptr,
                             graph=graph)
    h_dict = jax.block_until_ready(h_dict)

    assert h_dict["node"].shape == (num_nodes, embed_dim)
    assert h_dict["dag"].shape == (2, embed_dim)
    assert h_dict["glob"].shape == (2, embed_dim)
    assert all(bool(jnp.all(jnp.isfinite(v))) for v in h_dict.values())
    print("KERNEL_OK")
</pallas_src>

<mosaic_0001>
module attributes {stable_mosaic.version = 11 : i64} {
  func.func @_encoder_kernel(%arg0: i32, %arg1: memref<16x128xf32, #tpu.memory_space<vmem>>, %arg2: memref<1x128x128xbf16, #tpu.memory_space<vmem>>, %arg3: memref<1x128x128xbf16, #tpu.memory_space<vmem>>, %arg4: memref<1x1x128xf32, #tpu.memory_space<vmem>>, %arg5: memref<1x128xf32, #tpu.memory_space<vmem>>, %arg6: memref<128x128xbf16, #tpu.memory_space<vmem>>, %arg7: memref<128x128xbf16, #tpu.memory_space<vmem>>, %arg8: memref<16x16x16xbf16, #tpu.memory_space<vmem>>, %arg9: memref<16x16x1xf32, #tpu.memory_space<vmem>>, %arg10: memref<16x128xf32, #tpu.memory_space<vmem>>, %arg11: memref<16x128xf32, #tpu.memory_space<vmem>>, %arg12: memref<16x128xf32, #tpu.memory_space<vmem>>, %arg13: memref<16x128xf32, #tpu.memory_space<vmem>>) attributes {dimension_semantics = [#tpu.dimension_semantics<arbitrary>], iteration_bounds = array<i64: 2>, scalar_prefetch = 0 : i64, scratch_operands = 1 : i64, tpu.core_type = #tpu.core_type<tc>, window_params = [{pipeline_mode = #tpu.pipeline_mode<synchronous>, transform_indices = @transform_0, window_bounds = array<i64: 16, 128>}, {transform_indices = @transform_1, window_bounds = array<i64: 1, 128, 128>}, {transform_indices = @transform_2, window_bounds = array<i64: 1, 128, 128>}, {transform_indices = @transform_3, window_bounds = array<i64: 1, 1, 128>}, {pipeline_mode = #tpu.pipeline_mode<synchronous>, transform_indices = @transform_4, window_bounds = array<i64: 1, 128>}, {pipeline_mode = #tpu.pipeline_mode<synchronous>, transform_indices = @transform_5, window_bounds = array<i64: 128, 128>}, {pipeline_mode = #tpu.pipeline_mode<synchronous>, transform_indices = @transform_6, window_bounds = array<i64: 128, 128>}, {pipeline_mode = #tpu.pipeline_mode<synchronous>, transform_indices = @transform_7, window_bounds = array<i64: 16, 16, 16>}, {pipeline_mode = #tpu.pipeline_mode<synchronous>, transform_indices = @transform_8, window_bounds = array<i64: 16, 16, 1>}, {pipeline_mode = #tpu.pipeline_mode<synchronous>, transform_indices = @transform_9, window_bounds = array<i64: 16, 128>}, {pipeline_mode = #tpu.pipeline_mode<synchronous>, transform_indices = @transform_10, window_bounds = array<i64: 16, 128>}, {pipeline_mode = #tpu.pipeline_mode<synchronous>, transform_indices = @transform_11, window_bounds = array<i64: 16, 128>}]} {
    %c0_i32 = arith.constant 0 : i32
    %0 = arith.cmpi eq, %arg0, %c0_i32 : i32
    %1 = arith.extui %0 : i1 to i32
    %c0_i32_0 = arith.constant 0 : i32
    %2 = arith.cmpi ne, %1, %c0_i32_0 : i32
    scf.if %2 {
      %c0_61 = arith.constant 0 : index
      %c0_62 = arith.constant 0 : index
      %92 = vector.load %arg1[%c0_61, %c0_62] : memref<16x128xf32, #tpu.memory_space<vmem>>, vector<16x128xf32>
      %c0_63 = arith.constant 0 : index
      %c0_64 = arith.constant 0 : index
      %c0_65 = arith.constant 0 : index
      %93 = vector.load %arg8[%c0_63, %c0_64, %c0_65] : memref<16x16x16xbf16, #tpu.memory_space<vmem>>, vector<1x16x16xbf16>
      %94 = vector.shape_cast %93 : vector<1x16x16xbf16> to vector<16x16xbf16>
      %95 = arith.truncf %92 : vector<16x128xf32> to vector<16x128xbf16>
      %cst_66 = arith.constant dense<0.000000e+00> : vector<16x128xf32>
      %96 = tpu.matmul %94, %95, %cst_66 {dimension_numbers = #tpu.dot_dimension_numbers<[1], [0], [0], [1], [0, 0, 1, 1], [], []>} : vector<16x16xbf16>, vector<16x128xbf16>, vector<16x128xf32> -> vector<16x128xf32>
      %c0_67 = arith.constant 0 : index
      %c0_68 = arith.constant 0 : index
      %c0_69 = arith.constant 0 : index
      %97 = vector.load %arg9[%c0_67, %c0_68, %c0_69] : memref<16x16x1xf32, #tpu.memory_space<vmem>>, vector<1x16x1xf32>
      %98 = vector.shape_cast %97 : vector<1x16x1xf32> to vector<16x1xf32>
      %99 = vector.broadcast %98 : vector<16x1xf32> to vector<16x128xf32>
      %100 = arith.addf %96, %99 : vector<16x128xf32>
      %cst_70 = arith.constant 0.000000e+00 : f32
      %101 = vector.broadcast %cst_70 : f32 to vector<16x128xf32>
      %102 = arith.cmpf oge, %100, %101 : vector<16x128xf32>
      %cst_71 = arith.constant 0.00999999977 : f32
      %103 = vector.broadcast %cst_71 : f32 to vector<16x128xf32>
      %104 = arith.mulf %103, %100 : vector<16x128xf32>
      %105 = arith.select %102, %100, %104 : vector<16x128xi1>, vector<16x128xf32>
      %c1 = arith.constant 1 : index
      %c0_72 = arith.constant 0 : index
      %c0_73 = arith.constant 0 : index
      %106 = vector.load %arg8[%c1, %c0_72, %c0_73] : memref<16x16x16xbf16, #tpu.memory_space<vmem>>, vector<1x16x16xbf16>
      %107 = vector.shape_cast %106 : vector<1x16x16xbf16> to vector<16x16xbf16>
      %108 = arith.truncf %105 : vector<16x128xf32> to vector<16x128xbf16>
      %cst_74 = arith.constant dense<0.000000e+00> : vector<16x128xf32>
      %109 = tpu.matmul %107, %108, %cst_74 {dimension_numbers = #tpu.dot_dimension_numbers<[1], [0], [0], [1], [0, 0, 1, 1], [], []>} : vector<16x16xbf16>, vector<16x128xbf16>, vector<16x128xf32> -> vector<16x128xf32>
      %c1_75 = arith.constant 1 : index
      %c0_76 = arith.constant 0 : index
      %c0_77 = arith.constant 0 : index
      %110 = vector.load %arg9[%c1_75, %c0_76, %c0_77] : memref<16x16x1xf32, #tpu.memory_space<vmem>>, vector<1x16x1xf32>
      %111 = vector.shape_cast %110 : vector<1x16x1xf32> to vector<16x1xf32>
      %112 = vector.broadcast %111 : vector<16x1xf32> to vector<16x128xf32>
      %113 = arith.addf %109, %112 : vector<16x128xf32>
      %cst_78 = arith.constant 0.000000e+00 : f32
      %114 = vector.broadcast %cst_78 : f32 to vector<16x128xf32>
      %115 = arith.cmpf oge, %113, %114 : vector<16x128xf32>
      %cst_79 = arith.constant 0.00999999977 : f32
      %116 = vector.broadcast %cst_79 : f32 to vector<16x128xf32>
      %117 = arith.mulf %116, %113 : vector<16x128xf32>
      %118 = arith.select %115, %113, %117 : vector<16x128xi1>, vector<16x128xf32>
      %c2 = arith.constant 2 : index
      %c0_80 = arith.constant 0 : index
      %c0_81 = arith.constant 0 : index
      %119 = vector.load %arg8[%c2, %c0_80, %c0_81] : memref<16x16x16xbf16, #tpu.memory_space<vmem>>, vector<1x16x16xbf16>
      %120 = vector.shape_cast %119 : vector<1x16x16xbf16> to vector<16x16xbf16>
      %121 = arith.truncf %118 : vector<16x128xf32> to vector<16x128xbf16>
      %cst_82 = arith.constant dense<0.000000e+00> : vector<16x128xf32>
      %122 = tpu.matmul %120, %121, %cst_82 {dimension_numbers = #tpu.dot_dimension_numbers<[1], [0], [0], [1], [0, 0, 1, 1], [], []>} : vector<16x16xbf16>, vector<16x128xbf16>, vector<16x128xf32> -> vector<16x128xf32>
      %c2_83 = arith.constant 2 : index
      %c0_84 = arith.constant 0 : index
      %c0_85 = arith.constant 0 : index
      %123 = vector.load %arg9[%c2_83, %c0_84, %c0_85] : memref<16x16x1xf32, #tpu.memory_space<vmem>>, vector<1x16x1xf32>
      %124 = vector.shape_cast %123 : vector<1x16x1xf32> to vector<16x1xf32>
      %125 = vector.broadcast %124 : vector<16x1xf32> to vector<16x128xf32>
      %126 = arith.addf %122, %125 : vector<16x128xf32>
      %c0_86 = arith.constant 0 : index
      %c0_87 = arith.constant 0 : index
      %127 = vector.load %arg13[%c0_86, %c0_87] : memref<16x128xf32, #tpu.memory_space<vmem>>, vector<16x128xf32>
      tpu.vector_store %arg13[%c0_86, %c0_87], %126 {strides = array<i32>} : memref<16x128xf32, #tpu.memory_space<vmem>>, vector<16x128xf32>,
      %c0_88 = arith.constant 0 : index
      %c0_89 = arith.constant 0 : index
      %128 = vector.load %arg5[%c0_88, %c0_89] : memref<1x128xf32, #tpu.memory_space<vmem>>, vector<1x128xf32>
      %c6_90 = arith.constant 6 : index
      %c0_91 = arith.constant 0 : index
      %c0_92 = arith.constant 0 : index
      %129 = vector.load %arg8[%c6_90, %c0_91, %c0_92] : memref<16x16x16xbf16, #tpu.memory_space<vmem>>, vector<1x16x16xbf16>
      %130 = vector.shape_cast %129 : vector<1x16x16xbf16> to vector<16x16xbf16>
      %131 = arith.truncf %126 : vector<16x128xf32> to vector<16x128xbf16>
      %cst_93 = arith.constant dense<0.000000e+00> : vector<16x128xf32>
      %132 = tpu.matmul %130, %131, %cst_93 {dimension_numbers = #tpu.dot_dimension_numbers<[1], [0], [0], [1], [0, 0, 1, 1], [], []>} : vector<16x16xbf16>, vector<16x128xbf16>, vector<16x128xf32> -> vector<16x128xf32>
      %c6_94 = arith.constant 6 : index
      %c0_95 = arith.constant 0 : index
      %c0_96 = arith.constant 0 : index
      %133 = vector.load %arg9[%c6_94, %c0_95, %c0_96] : memref<16x16x1xf32, #tpu.memory_space<vmem>>, vector<1x16x1xf32>
      %134 = vector.shape_cast %133 : vector<1x16x1xf32> to vector<16x1xf32>
      %135 = vector.broadcast %134 : vector<16x1xf32> to vector<16x128xf32>
      %136 = arith.addf %132, %135 : vector<16x128xf32>
      %cst_97 = arith.constant 0.000000e+00 : f32
      %137 = vector.broadcast %cst_97 : f32 to vector<16x128xf32>
      %138 = arith.cmpf oge, %136, %137 : vector<16x128xf32>
      %cst_98 = arith.constant 0.00999999977 : f32
      %139 = vector.broadcast %cst_98 : f32 to vector<16x128xf32>
      %140 = arith.mulf %139, %136 : vector<16x128xf32>
      %141 = arith.select %138, %136, %140 : vector<16x128xi1>, vector<16x128xf32>
      %c7_99 = arith.constant 7 : index
      %c0_100 = arith.constant 0 : index
      %c0_101 = arith.constant 0 : index
      %142 = vector.load %arg8[%c7_99, %c0_100, %c0_101] : memref<16x16x16xbf16, #tpu.memory_space<vmem>>, vector<1x16x16xbf16>
      %143 = vector.shape_cast %142 : vector<1x16x16xbf16> to vector<16x16xbf16>
      %144 = arith.truncf %141 : vector<16x128xf32> to vector<16x128xbf16>
      %cst_102 = arith.constant dense<0.000000e+00> : vector<16x128xf32>
      %145 = tpu.matmul %143, %144, %cst_102 {dimension_numbers = #tpu.dot_dimension_numbers<[1], [0], [0], [1], [0, 0, 1, 1], [], []>} : vector<16x16xbf16>, vector<16x128xbf16>, vector<16x128xf32> -> vector<16x128xf32>
      %c7_103 = arith.constant 7 : index
      %c0_104 = arith.constant 0 : index
      %c0_105 = arith.constant 0 : index
      %146 = vector.load %arg9[%c7_103, %c0_104, %c0_105] : memref<16x16x1xf32, #tpu.memory_space<vmem>>, vector<1x16x1xf32>
      %147 = vector.shape_cast %146 : vector<1x16x1xf32> to vector<16x1xf32>
      %148 = vector.broadcast %147 : vector<16x1xf32> to vector<16x128xf32>
      %149 = arith.addf %145, %148 : vector<16x128xf32>
      %cst_106 = arith.constant 0.000000e+00 : f32
      %150 = vector.broadcast %cst_106 : f32 to vector<16x128xf32>
      %151 = arith.cmpf oge, %149, %150 : vector<16x128xf32>
      %cst_107 = arith.constant 0.00999999977 : f32
      %152 = vector.broadcast %cst_107 : f32 to vector<16x128xf32>
      %153 = arith.mulf %152, %149 : vector<16x128xf32>
      %154 = arith.select %151, %149, %153 : vector<16x128xi1>, vector<16x128xf32>
      %c8_108 = arith.constant 8 : index
      %c0_109 = arith.constant 0 : index
      %c0_110 = arith.constant 0 : index
      %155 = vector.load %arg8[%c8_108, %c0_109, %c0_110] : memref<16x16x16xbf16, #tpu.memory_space<vmem>>, vector<1x16x16xbf16>
      %156 = vector.shape_cast %155 : vector<1x16x16xbf16> to vector<16x16xbf16>
      %157 = arith.truncf %154 : vector<16x128xf32> to vector<16x128xbf16>
      %cst_111 = arith.constant dense<0.000000e+00> : vector<16x128xf32>
      %158 = tpu.matmul %156, %157, %cst_111 {dimension_numbers = #tpu.dot_dimension_numbers<[1], [0], [0], [1], [0, 0, 1, 1], [], []>} : vector<16x16xbf16>, vector<16x128xbf16>, vector<16x128xf32> -> vector<16x128xf32>
      %c8_112 = arith.constant 8 : index
      %c0_113 = arith.constant 0 : index
      %c0_114 = arith.constant 0 : index
      %159 = vector.load %arg9[%c8_112, %c0_113, %c0_114] : memref<16x16x1xf32, #tpu.memory_space<vmem>>, vector<1x16x1xf32>
      %160 = vector.shape_cast %159 : vector<1x16x1xf32> to vector<16x1xf32>
      %161 = vector.broadcast %160 : vector<16x1xf32> to vector<16x128xf32>
      %162 = arith.addf %158, %161 : vector<16x128xf32>
      %163 = vector.broadcast %128 : vector<1x128xf32> to vector<16x128xf32>
      %164 = arith.mulf %163, %162 : vector<16x128xf32>
      %c0_115 = arith.constant 0 : index
      %c0_116 = arith.constant 0 : index
      %165 = vector.load %arg10[%c0_115, %c0_116] : memref<16x128xf32, #tpu.memory_space<vmem>>, vector<16x128xf32>
      tpu.vector_store %arg10[%c0_115, %c0_116], %164 {strides = array<i32>} : memref<16x128xf32, #tpu.memory_space<vmem>>, vector<16x128xf32>,
    } else {
    }
    %c0 = arith.constant 0 : index
    %c0_1 = arith.constant 0 : index
    %3 = vector.load %arg10[%c0, %c0_1] : memref<16x128xf32, #tpu.memory_space<vmem>>, vector<16x128xf32>
    %c3 = arith.constant 3 : index
    %c0_2 = arith.constant 0 : index
    %c0_3 = arith.constant 0 : index
    %4 = vector.load %arg8[%c3, %c0_2, %c0_3] : memref<16x16x16xbf16, #tpu.memory_space<vmem>>, vector<1x16x16xbf16>
    %5 = vector.shape_cast %4 : vector<1x16x16xbf16> to vector<16x16xbf16>
    %6 = arith.truncf %3 : vector<16x128xf32> to vector<16x128xbf16>
    %cst = arith.constant dense<0.000000e+00> : vector<16x128xf32>
    %7 = tpu.matmul %5, %6, %cst {dimension_numbers = #tpu.dot_dimension_numbers<[1], [0], [0], [1], [0, 0, 1, 1], [], []>} : vector<16x16xbf16>, vector<16x128xbf16>, vector<16x128xf32> -> vector<16x128xf32>
    %c3_4 = arith.constant 3 : index
    %c0_5 = arith.constant 0 : index
    %c0_6 = arith.constant 0 : index
    %8 = vector.load %arg9[%c3_4, %c0_5, %c0_6] : memref<16x16x1xf32, #tpu.memory_space<vmem>>, vector<1x16x1xf32>
    %9 = vector.shape_cast %8 : vector<1x16x1xf32> to vector<16x1xf32>
    %10 = vector.broadcast %9 : vector<16x1xf32> to vector<16x128xf32>
    %11 = arith.addf %7, %10 : vector<16x128xf32>
    %cst_7 = arith.constant 0.000000e+00 : f32
    %12 = vector.broadcast %cst_7 : f32 to vector<16x128xf32>
    %13 = arith.cmpf oge, %11, %12 : vector<16x128xf32>
    %cst_8 = arith.constant 0.00999999977 : f32
    %14 = vector.broadcast %cst_8 : f32 to vector<16x128xf32>
    %15 = arith.mulf %14, %11 : vector<16x128xf32>
    %16 = arith.select %13, %11, %15 : vector<16x128xi1>, vector<16x128xf32>
    %c4 = arith.constant 4 : index
    %c0_9 = arith.constant 0 : index
    %c0_10 = arith.constant 0 : index
    %17 = vector.load %arg8[%c4, %c0_9, %c0_10] : memref<16x16x16xbf16, #tpu.memory_space<vmem>>, vector<1x16x16xbf16>
    %18 = vector.shape_cast %17 : vector<1x16x16xbf16> to vector<16x16xbf16>
    %19 = arith.truncf %16 : vector<16x128xf32> to vector<16x128xbf16>
    %cst_11 = arith.constant dense<0.000000e+00> : vector<16x128xf32>
    %20 = tpu.matmul %18, %19, %cst_11 {dimension_numbers = #tpu.dot_dimension_numbers<[1], [0], [0], [1], [0, 0, 1, 1], [], []>} : vector<16x16xbf16>, vector<16x128xbf16>, vector<16x128xf32> -> vector<16x128xf32>
    %c4_12 = arith.constant 4 : index
    %c0_13 = arith.constant 0 : index
    %c0_14 = arith.constant 0 : index
    %21 = vector.load %arg9[%c4_12, %c0_13, %c0_14] : memref<16x16x1xf32, #tpu.memory_space<vmem>>, vector<1x16x1xf32>
    %22 = vector.shape_cast %21 : vector<1x16x1xf32> to vector<16x1xf32>
    %23 = vector.broadcast %22 : vector<16x1xf32> to vector<16x128xf32>
    %24 = arith.addf %20, %23 : vector<16x128xf32>
    %cst_15 = arith.constant 0.000000e+00 : f32
    %25 = vector.broadcast %cst_15 : f32 to vector<16x128xf32>
    %26 = arith.cmpf oge, %24, %25 : vector<16x128xf32>
    %cst_16 = arith.constant 0.00999999977 : f32
    %27 = vector.broadcast %cst_16 : f32 to vector<16x128xf32>
    %28 = arith.mulf %27, %24 : vector<16x128xf32>
    %29 = arith.select %26, %24, %28 : vector<16x128xi1>, vector<16x128xf32>
    %c5 = arith.constant 5 : index
    %c0_17 = arith.constant 0 : index
    %c0_18 = arith.constant 0 : index
    %30 = vector.load %arg8[%c5, %c0_17, %c0_18] : memref<16x16x16xbf16, #tpu.memory_space<vmem>>, vector<1x16x16xbf16>
    %31 = vector.shape_cast %30 : vector<1x16x16xbf16> to vector<16x16xbf16>
    %32 = arith.truncf %29 : vector<16x128xf32> to vector<16x128xbf16>
    %cst_19 = arith.constant dense<0.000000e+00> : vector<16x128xf32>
    %33 = tpu.matmul %31, %32, %cst_19 {dimension_numbers = #tpu.dot_dimension_numbers<[1], [0], [0], [1], [0, 0, 1, 1], [], []>} : vector<16x16xbf16>, vector<16x128xbf16>, vector<16x128xf32> -> vector<16x128xf32>
    %c5_20 = arith.constant 5 : index
    %c0_21 = arith.constant 0 : index
    %c0_22 = arith.constant 0 : index
    %34 = vector.load %arg9[%c5_20, %c0_21, %c0_22] : memref<16x16x1xf32, #tpu.memory_space<vmem>>, vector<1x16x1xf32>
    %35 = vector.shape_cast %34 : vector<1x16x1xf32> to vector<16x1xf32>
    %36 = vector.broadcast %35 : vector<16x1xf32> to vector<16x128xf32>
    %37 = arith.addf %33, %36 : vector<16x128xf32>
    %38 = arith.truncf %37 : vector<16x128xf32> to vector<16x128xbf16>
    %c0_23 = arith.constant 0 : index
    %c0_24 = arith.constant 0 : index
    %c0_25 = arith.constant 0 : index
    %39 = vector.load %arg2[%c0_23, %c0_24, %c0_25] : memref<1x128x128xbf16, #tpu.memory_space<vmem>>, vector<1x128x128xbf16>
    %40 = vector.shape_cast %39 : vector<1x128x128xbf16> to vector<128x128xbf16>
    %cst_26 = arith.constant dense<0.000000e+00> : vector<16x128xf32>
    %41 = tpu.matmul %38, %40, %cst_26 {dimension_numbers = #tpu.dot_dimension_numbers<[1], [0], [0], [1], [0, 0, 1, 1], [], []>} : vector<16x128xbf16>, vector<128x128xbf16>, vector<16x128xf32> -> vector<16x128xf32>
    %c6 = arith.constant 6 : index
    %c0_27 = arith.constant 0 : index
    %c0_28 = arith.constant 0 : index
    %42 = vector.load %arg8[%c6, %c0_27, %c0_28] : memref<16x16x16xbf16, #tpu.memory_space<vmem>>, vector<1x16x16xbf16>
    %43 = vector.shape_cast %42 : vector<1x16x16xbf16> to vector<16x16xbf16>
    %44 = arith.truncf %41 : vector<16x128xf32> to vector<16x128xbf16>
    %cst_29 = arith.constant dense<0.000000e+00> : vector<16x128xf32>
    %45 = tpu.matmul %43, %44, %cst_29 {dimension_numbers = #tpu.dot_dimension_numbers<[1], [0], [0], [1], [0, 0, 1, 1], [], []>} : vector<16x16xbf16>, vector<16x128xbf16>, vector<16x128xf32> -> vector<16x128xf32>
    %c6_30 = arith.constant 6 : index
    %c0_31 = arith.constant 0 : index
    %c0_32 = arith.constant 0 : index
    %46 = vector.load %arg9[%c6_30, %c0_31, %c0_32] : memref<16x16x1xf32, #tpu.memory_space<vmem>>, vector<1x16x1xf32>
    %47 = vector.shape_cast %46 : vector<1x16x1xf32> to vector<16x1xf32>
    %48 = vector.broadcast %47 : vector<16x1xf32> to vector<16x128xf32>
    %49 = arith.addf %45, %48 : vector<16x128xf32>
    %cst_33 = arith.constant 0.000000e+00 : f32
    %50 = vector.broadcast %cst_33 : f32 to vector<16x128xf32>
    %51 = arith.cmpf oge, %49, %50 : vector<16x128xf32>
    %cst_34 = arith.constant 0.00999999977 : f32
    %52 = vector.broadcast %cst_34 : f32 to vector<16x128xf32>
    %53 = arith.mulf %52, %49 : vector<16x128xf32>
    %54 = arith.select %51, %49, %53 : vector<16x128xi1>, vector<16x128xf32>
    %c7 = arith.constant 7 : index
    %c0_35 = arith.constant 0 : index
    %c0_36 = arith.constant 0 : index
    %55 = vector.load %arg8[%c7, %c0_35, %c0_36] : memref<16x16x16xbf16, #tpu.memory_space<vmem>>, vector<1x16x16xbf16>
    %56 = vector.shape_cast %55 : vector<1x16x16xbf16> to vector<16x16xbf16>
    %57 = arith.truncf %54 : vector<16x128xf32> to vector<16x128xbf16>
    %cst_37 = arith.constant dense<0.000000e+00> : vector<16x128xf32>
    %58 = tpu.matmul %56, %57, %cst_37 {dimension_numbers = #tpu.dot_dimension_numbers<[1], [0], [0], [1], [0, 0, 1, 1], [], []>} : vector<16x16xbf16>, vector<16x128xbf16>, vector<16x128xf32> -> vector<16x128xf32>
    %c7_38 = arith.constant 7 : index
    %c0_39 = arith.constant 0 : index
    %c0_40 = arith.constant 0 : index
    %59 = vector.load %arg9[%c7_38, %c0_39, %c0_40] : memref<16x16x1xf32, #tpu.memory_space<vmem>>, vector<1x16x1xf32>
    %60 = vector.shape_cast %59 : vector<1x16x1xf32> to vector<16x1xf32>
    %61 = vector.broadcast %60 : vector<16x1xf32> to vector<16x128xf32>
    %62 = arith.addf %58, %61 : vector<16x128xf32>
    %cst_41 = arith.constant 0.000000e+00 : f32
    %63 = vector.broadcast %cst_41 : f32 to vector<16x128xf32>
    %64 = arith.cmpf oge, %62, %63 : vector<16x128xf32>
    %cst_42 = arith.constant 0.00999999977 : f32
    %65 = vector.broadcast %cst_42 : f32 to vector<16x128xf32>
    %66 = arith.mulf %65, %62 : vector<16x128xf32>
    %67 = arith.select %64, %62, %66 : vector<16x128xi1>, vector<16x128xf32>
    %c8 = arith.constant 8 : index
    %c0_43 = arith.constant 0 : index
    %c0_44 = arith.constant 0 : index
    %68 = vector.load %arg8[%c8, %c0_43, %c0_44] : memref<16x16x16xbf16, #tpu.memory_space<vmem>>, vector<1x16x16xbf16>
    %69 = vector.shape_cast %68 : vector<1x16x16xbf16> to vector<16x16xbf16>
    %70 = arith.truncf %67 : vector<16x128xf32> to vector<16x128xbf16>
    %cst_45 = arith.constant dense<0.000000e+00> : vector<16x128xf32>
    %71 = tpu.matmul %69, %70, %cst_45 {dimension_numbers = #tpu.dot_dimension_numbers<[1], [0], [0], [1], [0, 0, 1, 1], [], []>} : vector<16x16xbf16>, vector<16x128xbf16>, vector<16x128xf32> -> vector<16x128xf32>
    %c8_46 = arith.constant 8 : index
    %c0_47 = arith.constant 0 : index
    %c0_48 = arith.constant 0 : index
    %72 = vector.load %arg9[%c8_46, %c0_47, %c0_48] : memref<16x16x1xf32, #tpu.memory_space<vmem>>, vector<1x16x1xf32>
    %73 = vector.shape_cast %72 : vector<1x16x1xf32> to vector<16x1xf32>
    %74 = vector.broadcast %73 : vector<16x1xf32> to vector<16x128xf32>
    %75 = arith.addf %71, %74 : vector<16x128xf32>
    %76 = arith.truncf %75 : vector<16x128xf32> to vector<16x128xbf16>
    %c0_49 = arith.constant 0 : index
    %c0_50 = arith.constant 0 : index
    %c0_51 = arith.constant 0 : index
    %77 = vector.load %arg3[%c0_49, %c0_50, %c0_51] : memref<1x128x128xbf16, #tpu.memory_space<vmem>>, vector<1x128x128xbf16>
    %78 = vector.shape_cast %77 : vector<1x128x128xbf16> to vector<128x128xbf16>
    %cst_52 = arith.constant dense<0.000000e+00> : vector<16x128xf32>
    %79 = tpu.matmul %76, %78, %cst_52 {dimension_numbers = #tpu.dot_dimension_numbers<[1], [0], [0], [1], [0, 0, 1, 1], [], []>} : vector<16x128xbf16>, vector<128x128xbf16>, vector<16x128xf32> -> vector<16x128xf32>
    %c0_53 = arith.constant 0 : index
    %c0_54 = arith.constant 0 : index
    %80 = vector.load %arg13[%c0_53, %c0_54] : memref<16x128xf32, #tpu.memory_space<vmem>>, vector<16x128xf32>
    %81 = arith.addf %80, %79 : vector<16x128xf32>
    %c0_55 = arith.constant 0 : index
    %c0_56 = arith.constant 0 : index
    %c0_57 = arith.constant 0 : index
    %82 = vector.load %arg4[%c0_55, %c0_56, %c0_57] : memref<1x1x128xf32, #tpu.memory_space<vmem>>, vector<1x1x128xf32>
    %83 = vector.shape_cast %82 : vector<1x1x128xf32> to vector<1x128xf32>
    %84 = arith.subf %81, %3 : vector<16x128xf32>
    %85 = vector.broadcast %83 : vector<1x128xf32> to vector<16x128xf32>
    %86 = arith.mulf %85, %84 : vector<16x128xf32>
    %87 = arith.addf %3, %86 : vector<16x128xf32>
    %c0_58 = arith.constant 0 : index
    %c0_59 = arith.constant 0 : index
    %88 = vector.load %arg10[%c0_58, %c0_59] : memref<16x128xf32, #tpu.memory_space<vmem>>, vector<16x128xf32>
    tpu.vector_store %arg10[%c0_58, %c0_59], %87 {strides = array<i32>} : memref<16x128xf32, #tpu.memory_space<vmem>>, vector<16x128xf32>,
    %c1_i32 = arith.constant 1 : i32
    %89 = arith.cmpi eq, %arg0, %c1_i32 : i32
    %90 = arith.extui %89 : i1 to i32
    %c0_i32_60 = arith.constant 0 : i32
    %91 = arith.cmpi ne, %90, %c0_i32_60 : i32
    scf.if %91 {
      %c0_61 = arith.constant 0 : index
      %c0_62 = arith.constant 0 : index
      %92 = vector.load %arg10[%c0_61, %c0_62] : memref<16x128xf32, #tpu.memory_space<vmem>>, vector<16x128xf32>
      %c0_63 = arith.constant 0 : index
      %c0_64 = arith.constant 0 : index
      %93 = vector.load %arg1[%c0_63, %c0_64] : memref<16x128xf32, #tpu.memory_space<vmem>>, vector<16x128xf32>
      %c9 = arith.constant 9 : index
      %c0_65 = arith.constant 0 : index
      %c0_66 = arith.constant 0 : index
      %94 = vector.load %arg8[%c9, %c0_65, %c0_66] : memref<16x16x16xbf16, #tpu.memory_space<vmem>>, vector<1x16x16xbf16>
      %95 = vector.shape_cast %94 : vector<1x16x16xbf16> to vector<16x16xbf16>
      %96 = arith.truncf %93 : vector<16x128xf32> to vector<16x128xbf16>
      %cst_67 = arith.constant dense<0.000000e+00> : vector<16x128xf32>
      %97 = tpu.matmul %95, %96, %cst_67 {dimension_numbers = #tpu.dot_dimension_numbers<[1], [0], [0], [1], [0, 0, 1, 1], [], []>} : vector<16x16xbf16>, vector<16x128xbf16>, vector<16x128xf32> -> vector<16x128xf32>
      %c10 = arith.constant 10 : index
      %c0_68 = arith.constant 0 : index
      %c0_69 = arith.constant 0 : index
      %98 = vector.load %arg8[%c10, %c0_68, %c0_69] : memref<16x16x16xbf16, #tpu.memory_space<vmem>>, vector<1x16x16xbf16>
      %99 = vector.shape_cast %98 : vector<1x16x16xbf16> to vector<16x16xbf16>
      %100 = arith.truncf %92 : vector<16x128xf32> to vector<16x128xbf16>
      %cst_70 = arith.constant dense<0.000000e+00> : vector<16x128xf32>
      %101 = tpu.matmul %99, %100, %cst_70 {dimension_numbers = #tpu.dot_dimension_numbers<[1], [0], [0], [1], [0, 0, 1, 1], [], []>} : vector<16x16xbf16>, vector<16x128xbf16>, vector<16x128xf32> -> vector<16x128xf32>
      %102 = arith.addf %97, %101 : vector<16x128xf32>
      %c9_71 = arith.constant 9 : index
      %c0_72 = arith.constant 0 : index
      %c0_73 = arith.constant 0 : index
      %103 = vector.load %arg9[%c9_71, %c0_72, %c0_73] : memref<16x16x1xf32, #tpu.memory_space<vmem>>, vector<1x16x1xf32>
      %104 = vector.shape_cast %103 : vector<1x16x1xf32> to vector<16x1xf32>
      %105 = vector.broadcast %104 : vector<16x1xf32> to vector<16x128xf32>
      %106 = arith.addf %102, %105 : vector<16x128xf32>
      %cst_74 = arith.constant 0.000000e+00 : f32
      %107 = vector.broadcast %cst_74 : f32 to vector<16x128xf32>
      %108 = arith.cmpf oge, %106, %107 : vector<16x128xf32>
      %cst_75 = arith.constant 0.00999999977 : f32
      %109 = vector.broadcast %cst_75 : f32 to vector<16x128xf32>
      %110 = arith.mulf %109, %106 : vector<16x128xf32>
      %111 = arith.select %108, %106, %110 : vector<16x128xi1>, vector<16x128xf32>
      %c11 = arith.constant 11 : index
      %c0_76 = arith.constant 0 : index
      %c0_77 = arith.constant 0 : index
      %112 = vector.load %arg8[%c11, %c0_76, %c0_77] : memref<16x16x16xbf16, #tpu.memory_space<vmem>>, vector<1x16x16xbf16>
      %113 = vector.shape_cast %112 : vector<1x16x16xbf16> to vector<16x16xbf16>
      %114 = arith.truncf %111 : vector<16x128xf32> to vector<16x128xbf16>
      %cst_78 = arith.constant dense<0.000000e+00> : vector<16x128xf32>
      %115 = tpu.matmul %113, %114, %cst_78 {dimension_numbers = #tpu.dot_dimension_numbers<[1], [0], [0], [1], [0, 0, 1, 1], [], []>} : vector<16x16xbf16>, vector<16x128xbf16>, vector<16x128xf32> -> vector<16x128xf32>
      %c10_79 = arith.constant 10 : index
      %c0_80 = arith.constant 0 : index
      %c0_81 = arith.constant 0 : index
      %116 = vector.load %arg9[%c10_79, %c0_80, %c0_81] : memref<16x16x1xf32, #tpu.memory_space<vmem>>, vector<1x16x1xf32>
      %117 = vector.shape_cast %116 : vector<1x16x1xf32> to vector<16x1xf32>
      %118 = vector.broadcast %117 : vector<16x1xf32> to vector<16x128xf32>
      %119 = arith.addf %115, %118 : vector<16x128xf32>
      %cst_82 = arith.constant 0.000000e+00 : f32
      %120 = vector.broadcast %cst_82 : f32 to vector<16x128xf32>
      %121 = arith.cmpf oge, %119, %120 : vector<16x128xf32>
      %cst_83 = arith.constant 0.00999999977 : f32
      %122 = vector.broadcast %cst_83 : f32 to vector<16x128xf32>
      %123 = arith.mulf %122, %119 : vector<16x128xf32>
      %124 = arith.select %121, %119, %123 : vector<16x128xi1>, vector<16x128xf32>
      %c12 = arith.constant 12 : index
      %c0_84 = arith.constant 0 : index
      %c0_85 = arith.constant 0 : index
      %125 = vector.load %arg8[%c12, %c0_84, %c0_85] : memref<16x16x16xbf16, #tpu.memory_space<vmem>>, vector<1x16x16xbf16>
      %126 = vector.shape_cast %125 : vector<1x16x16xbf16> to vector<16x16xbf16>
      %127 = arith.truncf %124 : vector<16x128xf32> to vector<16x128xbf16>
      %cst_86 = arith.constant dense<0.000000e+00> : vector<16x128xf32>
      %128 = tpu.matmul %126, %127, %cst_86 {dimension_numbers = #tpu.dot_dimension_numbers<[1], [0], [0], [1], [0, 0, 1, 1], [], []>} : vector<16x16xbf16>, vector<16x128xbf16>, vector<16x128xf32> -> vector<16x128xf32>
      %c11_87 = arith.constant 11 : index
      %c0_88 = arith.constant 0 : index
      %c0_89 = arith.constant 0 : index
      %129 = vector.load %arg9[%c11_87, %c0_88, %c0_89] : memref<16x16x1xf32, #tpu.memory_space<vmem>>, vector<1x16x1xf32>
      %130 = vector.shape_cast %129 : vector<1x16x1xf32> to vector<16x1xf32>
      %131 = vector.broadcast %130 : vector<16x1xf32> to vector<16x128xf32>
      %132 = arith.addf %128, %131 : vector<16x128xf32>
      %133 = arith.truncf %132 : vector<16x128xf32> to vector<16x128xbf16>
      %c0_90 = arith.constant 0 : index
      %c0_91 = arith.constant 0 : index
      %134 = vector.load %arg6[%c0_90, %c0_91] : memref<128x128xbf16, #tpu.memory_space<vmem>>, vector<128x128xbf16>
      %cst_92 = arith.constant dense<0.000000e+00> : vector<16x128xf32>
      %135 = tpu.matmul %133, %134, %cst_92 {dimension_numbers = #tpu.dot_dimension_numbers<[1], [0], [0], [1], [0, 0, 1, 1], [], []>} : vector<16x128xbf16>, vector<128x128xbf16>, vector<16x128xf32> -> vector<16x128xf32>
      %c0_93 = arith.constant 0 : index
      %c0_94 = arith.constant 0 : index
      %136 = vector.load %arg11[%c0_93, %c0_94] : memref<16x128xf32, #tpu.memory_space<vmem>>, vector<16x128xf32>
      tpu.vector_store %arg11[%c0_93, %c0_94], %135 {strides = array<i32>} : memref<16x128xf32, #tpu.memory_space<vmem>>, vector<16x128xf32>,
      %c13 = arith.constant 13 : index
      %c0_95 = arith.constant 0 : index
      %c0_96 = arith.constant 0 : index
      %137 = vector.load %arg8[%c13, %c0_95, %c0_96] : memref<16x16x16xbf16, #tpu.memory_space<vmem>>, vector<1x16x16xbf16>
      %138 = vector.shape_cast %137 : vector<1x16x16xbf16> to vector<16x16xbf16>
      %139 = arith.truncf %135 : vector<16x128xf32> to vector<16x128xbf16>
      %cst_97 = arith.constant dense<0.000000e+00> : vector<16x128xf32>
      %140 = tpu.matmul %138, %139, %cst_97 {dimension_numbers = #tpu.dot_dimension_numbers<[1], [0], [0], [1], [0, 0, 1, 1], [], []>} : vector<16x16xbf16>, vector<16x128xbf16>, vector<16x128xf32> -> vector<16x128xf32>
      %c12_98 = arith.constant 12 : index
      %c0_99 = arith.constant 0 : index
      %c0_100 = arith.constant 0 : index
      %141 = vector.load %arg9[%c12_98, %c0_99, %c0_100] : memref<16x16x1xf32, #tpu.memory_space<vmem>>, vector<1x16x1xf32>
      %142 = vector.shape_cast %141 : vector<1x16x1xf32> to vector<16x1xf32>
      %143 = vector.broadcast %142 : vector<16x1xf32> to vector<16x128xf32>
      %144 = arith.addf %140, %143 : vector<16x128xf32>
      %cst_101 = arith.constant 0.000000e+00 : f32
      %145 = vector.broadcast %cst_101 : f32 to vector<16x128xf32>
      %146 = arith.cmpf oge, %144, %145 : vector<16x128xf32>
      %cst_102 = arith.constant 0.00999999977 : f32
      %147 = vector.broadcast %cst_102 : f32 to vector<16x128xf32>
      %148 = arith.mulf %147, %144 : vector<16x128xf32>
      %149 = arith.select %146, %144, %148 : vector<16x128xi1>, vector<16x128xf32>
      %c14 = arith.constant 14 : index
      %c0_103 = arith.constant 0 : index
      %c0_104 = arith.constant 0 : index
      %150 = vector.load %arg8[%c14, %c0_103, %c0_104] : memref<16x16x16xbf16, #tpu.memory_space<vmem>>, vector<1x16x16xbf16>
      %151 = vector.shape_cast %150 : vector<1x16x16xbf16> to vector<16x16xbf16>
      %152 = arith.truncf %149 : vector<16x128xf32> to vector<16x128xbf16>
      %cst_105 = arith.constant dense<0.000000e+00> : vector<16x128xf32>
      %153 = tpu.matmul %151, %152, %cst_105 {dimension_numbers = #tpu.dot_dimension_numbers<[1], [0], [0], [1], [0, 0, 1, 1], [], []>} : vector<16x16xbf16>, vector<16x128xbf16>, vector<16x128xf32> -> vector<16x128xf32>
      %c13_106 = arith.constant 13 : index
      %c0_107 = arith.constant 0 : index
      %c0_108 = arith.constant 0 : index
      %154 = vector.load %arg9[%c13_106, %c0_107, %c0_108] : memref<16x16x1xf32, #tpu.memory_space<vmem>>, vector<1x16x1xf32>
      %155 = vector.shape_cast %154 : vector<1x16x1xf32> to vector<16x1xf32>
      %156 = vector.broadcast %155 : vector<16x1xf32> to vector<16x128xf32>
      %157 = arith.addf %153, %156 : vector<16x128xf32>
      %cst_109 = arith.constant 0.000000e+00 : f32
      %158 = vector.broadcast %cst_109 : f32 to vector<16x128xf32>
      %159 = arith.cmpf oge, %157, %158 : vector<16x128xf32>
      %cst_110 = arith.constant 0.00999999977 : f32
      %160 = vector.broadcast %cst_110 : f32 to vector<16x128xf32>
      %161 = arith.mulf %160, %157 : vector<16x128xf32>
      %162 = arith.select %159, %157, %161 : vector<16x128xi1>, vector<16x128xf32>
      %c15 = arith.constant 15 : index
      %c0_111 = arith.constant 0 : index
      %c0_112 = arith.constant 0 : index
      %163 = vector.load %arg8[%c15, %c0_111, %c0_112] : memref<16x16x16xbf16, #tpu.memory_space<vmem>>, vector<1x16x16xbf16>
      %164 = vector.shape_cast %163 : vector<1x16x16xbf16> to vector<16x16xbf16>
      %165 = arith.truncf %162 : vector<16x128xf32> to vector<16x128xbf16>
      %cst_113 = arith.constant dense<0.000000e+00> : vector<16x128xf32>
      %166 = tpu.matmul %164, %165, %cst_113 {dimension_numbers = #tpu.dot_dimension_numbers<[1], [0], [0], [1], [0, 0, 1, 1], [], []>} : vector<16x16xbf16>, vector<16x128xbf16>, vector<16x128xf32> -> vector<16x128xf32>
      %c14_114 = arith.constant 14 : index
      %c0_115 = arith.constant 0 : index
      %c0_116 = arith.constant 0 : index
      %167 = vector.load %arg9[%c14_114, %c0_115, %c0_116] : memref<16x16x1xf32, #tpu.memory_space<vmem>>, vector<1x16x1xf32>
      %168 = vector.shape_cast %167 : vector<1x16x1xf32> to vector<16x1xf32>
      %169 = vector.broadcast %168 : vector<16x1xf32> to vector<16x128xf32>
      %170 = arith.addf %166, %169 : vector<16x128xf32>
      %171 = arith.truncf %170 : vector<16x128xf32> to vector<16x128xbf16>
      %c0_117 = arith.constant 0 : index
      %c0_118 = arith.constant 0 : index
      %172 = vector.load %arg7[%c0_117, %c0_118] : memref<128x128xbf16, #tpu.memory_space<vmem>>, vector<128x128xbf16>
      %cst_119 = arith.constant dense<0.000000e+00> : vector<16x128xf32>
      %173 = tpu.matmul %171, %172, %cst_119 {dimension_numbers = #tpu.dot_dimension_numbers<[1], [0], [0], [1], [0, 0, 1, 1], [], []>} : vector<16x128xbf16>, vector<128x128xbf16>, vector<16x128xf32> -> vector<16x128xf32>
      %c0_120 = arith.constant 0 : index
      %c0_121 = arith.constant 0 : index
      %174 = vector.load %arg12[%c0_120, %c0_121] : memref<16x128xf32, #tpu.memory_space<vmem>>, vector<16x128xf32>
      tpu.vector_store %arg12[%c0_120, %c0_121], %173 {strides = array<i32>} : memref<16x128xf32, #tpu.memory_space<vmem>>, vector<16x128xf32>,
    } else {
    }
    return
  }
  func.func @transform_0(%arg0: i32) -> (i32, i32) {
    %c0_i32 = arith.constant 0 : i32
    %c0_i32_0 = arith.constant 0 : i32
    %c0_i32_1 = arith.constant 0 : i32
    return %c0_i32, %c0_i32_0 : i32, i32
  }
  func.func @transform_1(%arg0: i32) -> (i32, i32, i32) {
    %c0_i32 = arith.constant 0 : i32
    %c0_i32_0 = arith.constant 0 : i32
    %c0_i32_1 = arith.constant 0 : i32
    return %arg0, %c0_i32, %c0_i32_0 : i32, i32, i32
  }
  func.func @transform_2(%arg0: i32) -> (i32, i32, i32) {
    %c0_i32 = arith.constant 0 : i32
    %c0_i32_0 = arith.constant 0 : i32
    %c0_i32_1 = arith.constant 0 : i32
    return %arg0, %c0_i32, %c0_i32_0 : i32, i32, i32
  }
  func.func @transform_3(%arg0: i32) -> (i32, i32, i32) {
    %c0_i32 = arith.constant 0 : i32
    %c0_i32_0 = arith.constant 0 : i32
    %c0_i32_1 = arith.constant 0 : i32
    return %arg0, %c0_i32, %c0_i32_0 : i32, i32, i32
  }
  func.func @transform_4(%arg0: i32) -> (i32, i32) {
    %c0_i32 = arith.constant 0 : i32
    %c0_i32_0 = arith.constant 0 : i32
    %c0_i32_1 = arith.constant 0 : i32
    return %c0_i32, %c0_i32_0 : i32, i32
  }
  func.func @transform_5(%arg0: i32) -> (i32, i32) {
    %c0_i32 = arith.constant 0 : i32
    %c0_i32_0 = arith.constant 0 : i32
    %c0_i32_1 = arith.constant 0 : i32
    return %c0_i32, %c0_i32_0 : i32, i32
  }
  func.func @transform_6(%arg0: i32) -> (i32, i32) {
    %c0_i32 = arith.constant 0 : i32
    %c0_i32_0 = arith.constant 0 : i32
    %c0_i32_1 = arith.constant 0 : i32
    return %c0_i32, %c0_i32_0 : i32, i32
  }
  func.func @transform_7(%arg0: i32) -> (i32, i32, i32) {
    %c0_i32 = arith.constant 0 : i32
    %c0_i32_0 = arith.constant 0 : i32
    %c0_i32_1 = arith.constant 0 : i32
    %c0_i32_2 = arith.constant 0 : i32
    return %c0_i32, %c0_i32_0, %c0_i32_1 : i32, i32, i32
  }
  func.func @transform_8(%arg0: i32) -> (i32, i32, i32) {
    %c0_i32 = arith.constant 0 : i32
    %c0_i32_0 = arith.constant 0 : i32
    %c0_i32_1 = arith.constant 0 : i32
    %c0_i32_2 = arith.constant 0 : i32
    return %c0_i32, %c0_i32_0, %c0_i32_1 : i32, i32, i32
  }
  func.func @transform_9(%arg0: i32) -> (i32, i32) {
    %c0_i32 = arith.constant 0 : i32
    %c0_i32_0 = arith.constant 0 : i32
    %c0_i32_1 = arith.constant 0 : i32
    return %c0_i32, %c0_i32_0 : i32, i32
  }
  func.func @transform_10(%arg0: i32) -> (i32, i32) {
    %c0_i32 = arith.constant 0 : i32
    %c0_i32_0 = arith.constant 0 : i32
    %c0_i32_1 = arith.constant 0 : i32
    return %c0_i32, %c0_i32_0 : i32, i32
  }
  func.func @transform_11(%arg0: i32) -> (i32, i32) {
    %c0_i32 = arith.constant 0 : i32
    %c0_i32_0 = arith.constant 0 : i32
    %c0_i32_1 = arith.constant 0 : i32
    return %c0_i32, %c0_i32_0 : i32, i32
  }
}

</mosaic_0001>

<bundles_post_ra>
// kernel: tpu_custom_call.1
= control target key start
LH: loop header
LB: loop body
LE: loop exit
PB: predicated region body
PF: predicated region fallthrough
CT: control target
= control target key end

     0   :  { %17 = vsyncpa [#allocation4], 0  ;;  %s3665_s0 = inlined_call_operand.vmem [shape: f32[16,128], index: 0, kind: input, shape index: {}]   ;;  %s3666_s1 = inlined_call_operand.vmem [shape: bf16[2,128,128], index: 1, kind: input, shape index: {}]   ;;  %s3667_s2 = inlined_call_operand.vmem [shape: bf16[2,128,128], index: 2, kind: input, shape index: {}]   ;;  %s3668_s3 = inlined_call_operand.vmem [shape: f32[2,1,128], index: 3, kind: input, shape index: {}]   ;;  %s3669_s4 = inlined_call_operand.vmem [shape: f32[1,128], index: 4, kind: input, shape index: {}]   ;;  %s3670_s5 = inlined_call_operand.hbm [shape: bf16[128,128], index: 5, kind: input, shape index: {}]   ;;  %s3671_s6 = inlined_call_operand.hbm [shape: bf16[128,128], index: 6, kind: input, shape index: {}]   ;;  %s3672_s7 = inlined_call_operand.hbm [shape: bf16[16,16,16], index: 7, kind: input, shape index: {}]   ;;  %s3673_s8 = inlined_call_operand.vmem [shape: f32[16,16,1], index: 8, kind: input, shape index: {}]   ;;  %s3674_s9 = inlined_call_operand.hbm [shape: f32[16,128], index: 9, kind: output, shape index: {0}]   ;;  %s3675_s10 = inlined_call_operand.hbm [shape: f32[16,128], index: 10, kind: output, shape index: {1}]   ;;  %s3676_s11 = inlined_call_operand.hbm [shape: f32[16,128], index: 11, kind: output, shape index: {2}]  }
   0x1   :  { %18 = vsyncpa [#allocation7], 0 }
   0x2   :  { %19 = vsyncpa [#allocation5], 0 }
   0x3   :  { %20 = vsyncpa [#allocation11], 0  ;;  %s3181_s17 = smov 0  }
   0x4 LB: > { %s3187_s18 = sadd.s32 4294967295, %s3100_s17   ;;  %p2387_p0 = scmp.ge.s32.totalorder %s3100_s17, 1  ;;  %s3100_s17 = sphi %s3181_s17, %s26_s17  }
   0x5   : > { %p298_p1 = scmp.lt.s32.totalorder %s3100_s17, 3  ;;  %p3677_p3 = scmp.eq.s32.totalorder %s3187_s18, 0 }
   0x6   : > { %s3102_s20 = smov [#allocation6]   ;;  %s3103_s22 = smov [#allocation3]  }
   0x7   : > { %p3193_p4 = pnand %p2387_p0, %p298_p1  ;;  %s329_s21 = sshll.u32 %s3102_s20, 4  ;;  %s330_s21 = int_to_ptr.vmem [resolvable:$true] %s329_s21 }
   0x8   : > { %s316_s23 = sshll.u32 %s3103_s22, 4  ;;  %s3104_s25 = smov [#allocation8]   ;;  %s3205_s23 = int_to_ptr.vmem [resolvable:$true] %s316_s23 }
   0x9   : > { %s3679_s19 = scalar_select %p3193_p4, 1, 0 }
   0xa   : > { %p2810_p5 = pneg %p3193_p4  ;;  %s342_s26 = sshll.u32 %s3104_s25, 4  ;;  %s3207_s26 = int_to_ptr.vmem [resolvable:$true] %s342_s26 }
   0xb   : > { %s2916_s29 = scalar_lea.hbm %s3671_s6, 1024 }
   0xc   : > { %p3201_p6 = pnand %p3677_p3, %p2810_p5  ;;  %p2917_p7 = scmp.ne.s32.totalorder %s3671_s6, %s2916_s29 }
   0xd   : > { %p2923_p11 = scmp.lt.u32.totalorder %s2916_s29, %s3671_s6 }
   0xe   : > { %p3217_p8 = pneg %p3201_p6 }
  0x10   : > { %p2919_p9 = pnand %p3217_p8, %p2917_p7 }
  0x12   : > { %p2920_p10 = pneg %p2919_p9 }
  0x14   : > { %p2925_p12 = pnand %p2923_p11, %p2920_p10 }
  0x16   : > { %2928 = shalt.err (!%p2925_p12)
}
  0x17   : > { %s2929_s16 = scalar_lea.vmem %s330_s21, 1024  ;;  %p2937_p5 = scmp.lt.s32.totalorder %s330_s21, %s330_s21 }
  0x18   : > { %p2930_p13 = scmp.ne.s32.totalorder %s330_s21, %s2929_s16  ;;  %p2938_p2 = scmp.lt.s32.totalorder %s2929_s16, %s2929_s16 }
  0x1a   : > { %p2932_p0 = pnand %p2930_p13, %p3217_p8  ;;  %p2939_p3 = por %p2938_p2, %p2937_p5 }
  0x1c   : > { %p2933_p1 = pneg %p2932_p0 }
  0x1e   : > { %p2940_p4 = pnand %p2939_p3, %p2933_p1 }
  0x20   : > { %2943 = shalt.err (!%p2940_p4)
}
  0x21   : > { %s3105_s20 = smov 64   ;;  %s3106_s22 = smov 4  }
  0x22   : > { %2816 = dma.hbm_to_vmem [thread:$0]  (!%p3201_p6), %s3671_s6, 1024, %s330_s21, [#allocation7], %s3105_s20, %s3105_s20, %s3106_s22  }
  0x23   : > { %s2944_s30 = scalar_lea.hbm %s3670_s5, 1024 }
  0x24   : > { %p2945_p2 = scmp.ne.s32.totalorder %s3670_s5, %s2944_s30  ;;  %p2951_p7 = scmp.lt.u32.totalorder %s2944_s30, %s3670_s5 }
  0x26   : > { %p2947_p3 = pnand %p2945_p2, %p3217_p8 }
  0x28   : > { %p2948_p4 = pneg %p2947_p3 }
  0x2a   : > { %p2953_p9 = pnand %p2951_p7, %p2948_p4 }
  0x2c   : > { %2956 = shalt.err (!%p2953_p9)
}
  0x2d   : > { %s2957_s21 = scalar_lea.vmem %s3205_s23, 1024  ;;  %p2965_p13 = scmp.lt.s32.totalorder %s3205_s23, %s3205_s23 }
  0x2e   : > { %p2958_p10 = scmp.ne.s32.totalorder %s3205_s23, %s2957_s21  ;;  %p2966_p0 = scmp.lt.s32.totalorder %s2957_s21, %s2957_s21 }
  0x30   : > { %p2960_p11 = pnand %p2958_p10, %p3217_p8  ;;  %p2967_p1 = por %p2966_p0, %p2965_p13 }
  0x32   : > { %p2961_p12 = pneg %p2960_p11 }
  0x34   : > { %p2968_p5 = pnand %p2967_p1, %p2961_p12 }
  0x36   : > { %2971 = shalt.err (!%p2968_p5)
}
  0x37   : > { %2813 = dma.hbm_to_vmem [thread:$0]  (!%p3201_p6), %s3670_s5, 1024, %s3205_s23, [#allocation4], %s3105_s20, %s3105_s20, %s3106_s22  }
  0x38   : > { %s2972_s30 = scalar_lea.hbm %s3672_s7, 2048 }
  0x39   : > { %p2973_p2 = scmp.ne.s32.totalorder %s3672_s7, %s2972_s30  ;;  %p2979_p7 = scmp.lt.u32.totalorder %s2972_s30, %s3672_s7 }
  0x3b   : > { %p2975_p3 = pnand %p2973_p2, %p3217_p8 }
  0x3d   : > { %p2976_p4 = pneg %p2975_p3 }
  0x3f   : > { %p2981_p9 = pnand %p2979_p7, %p2976_p4 }
  0x41   : > { %2984 = shalt.err (!%p2981_p9)
}
  0x42   : > { %s2985_s23 = scalar_lea.vmem %s3207_s26, 2048  ;;  %p2993_p13 = scmp.lt.s32.totalorder %s3207_s26, %s3207_s26 }
  0x43   : > { %p2986_p10 = scmp.ne.s32.totalorder %s3207_s26, %s2985_s23  ;;  %p2994_p0 = scmp.lt.s32.totalorder %s2985_s23, %s2985_s23 }
  0x45   : > { %p2988_p11 = pnand %p2986_p10, %p3217_p8  ;;  %p2995_p1 = por %p2994_p0, %p2993_p13 }
  0x47   : > { %p2989_p12 = pneg %p2988_p11 }
  0x49   : > { %p2996_p5 = pnand %p2995_p1, %p2989_p12 }
  0x4b   : > { %2999 = shalt.err (!%p2996_p5)
}
  0x4c   : > { %2819 = dma.hbm_to_vmem [thread:$0]  (!%p3201_p6), %s3672_s7, 2048, %s3207_s26, [#allocation7], %s3105_s20, %s3105_s20, %s3106_s22  }
  0x4d   : > { %p3682_p2 = scmp.ne.s32.totalorder %s3679_s19, 0 }
  0x4e   : > { %p3683_p8 = scmp.eq.s32.totalorder (!%p3682_p2), %s3187_s18, 0 }
  0x4f   : > { %383 = sbr.rel (%p3682_p2) target bundleno = 5081 (0x13d9), region = 56 }
  0x56   : > { %3083 = dma.done.wait (%p3683_p8), [#allocation4], 1024   ;;  %p3684_p3 = pmov %p3683_p8 }
  0x58   : > { %3085 = vsyncadd (%p3684_p3), [#allocation4], 4294966272  ;;  %p3685_p4 = pmov %p3684_p3 }
  0x59   : > { %p3686_p7 = pmov %p3684_p3 }
  0x5a   : > { %3087 = dma.done.wait (%p3685_p4), [#allocation7], 3072  }
  0x5b   : > { %3089 = vsyncadd (%p3686_p7), [#allocation7], 4294964224  ;;  %p434_p9 = scmp.lt.s32.totalorder %s3187_s18, 1  ;;  %p3687_p6 = scmp.ne.s32.totalorder %s3187_s18, 0 }
  0x5c   : > { %v452_v0 = vld [vmem:[%s3665_s0] sm:$0xff] (!%p3687_p6)  ;;  %v453_v1 = vld [vmem:[%s3665_s0 + $0x8] sm:$0xff] (!%p3687_p6)  ;;  %v3107_v2 = vmov (!%p3687_p6), 0.0   ;;  %vm3108_vm0 = vmmov (!%p3687_p6), 0   ;;  %v2861_v5 = vld [vmem:[#allocation8] sm:$0xff] (!%p3687_p6)   ;;  %v3109_v6 = vmov (!%p3687_p6), 0  }
  0x5d   : > { %s3300_s24 = scalar_select %p434_p9, %s3187_s18, 1 }
  0x5e   : > { %451 = sbr.rel (%p3687_p6) target bundleno = 1435 (0x59b), region = 72  ;;  %2592 = vmatprep.subr.bf16.mxu0 (!%p3687_p6), %v3107_v2  ;;  %v456_v3 = vpack.c.bf16 (!%p3687_p6), %v453_v1, %v452_v0  ;;  %2594 = vmatprep.mubr.msk.bf16.mxu0 (!%p3687_p6), %vm3108_vm0, %v3107_v2  ;;  %v457_v4 = vld [vmem:[%s3673_s8] sm:$0xff] (!%p3687_p6)  ;;  %vm474_vm1 = vcmask (!%p3687_p6), 130048   ;;  %v458_v7 = vld [vmem:[%s3673_s8 + $0x8] sm:$0xff] (!%p3687_p6)  ;;  %v2415_v10 = vld [vmem:[%s3673_s8 + $0x70] sm:$0xff] (!%p3687_p6) }
  0x5f   : > { %s2516_s19 = sshll.u32 %s3300_s24, 6  ;;  %s446_s20 = scalar_lea.vmem %s3668_s3, %s3300_s24  ;;  %2859 = vset.pattern.permute.xlu0 (!%p3687_p6), %v3109_v6  ;;  %2598 = vmatprep.subr.bf16.mxu1 (!%p3687_p6), %v3107_v2  ;;  %v2407_v8 = vld [vmem:[%s3673_s8 + $0x20] sm:$0xff] (!%p3687_p6)  ;;  %v2403_v12 = vld [vmem:[%s3673_s8 + $0x10] sm:$0xff] (!%p3687_p6)  ;;  %v2404_v13 = vld [vmem:[%s3673_s8 + $0x18] sm:$0xff] (!%p3687_p6) }
  0x60   : > { %s3310_s28 = scalar_lea.vmem %s3666_s1, %s2516_s19  ;;  %s3315_s12 = scalar_lea.vmem %s3667_s2, %s2516_s19  ;;  %2593 = vmatpush3.bf16.msra.mxu0 (!%p3687_p6), %v456_v3  ;;  %461 = vperm.xlu0 (!%p3687_p6), %2859, %v457_v4   ;;  %v2411_v9 = vld [vmem:[%s3673_s8 + $0x60] sm:$0xff] (!%p3687_p6)  ;;  %v2408_v14 = vld [vmem:[%s3673_s8 + $0x28] sm:$0xff] (!%p3687_p6)  ;;  %v2416_v16 = vld [vmem:[%s3673_s8 + $0x78] sm:$0xff] (!%p3687_p6) }
  0x61   : > { %2600 = vmatprep.mubr.msk.bf16.mxu1 (!%p3687_p6), %vm3108_vm0, %v3107_v2  ;;  %2860 = vset.pattern.permute.xlu1 (!%p3687_p6), %v3109_v6  ;;  %v2419_v11 = vld [vmem:[%s3673_s8 + $0x80] sm:$0xff] (!%p3687_p6)  ;;  %v2412_v15 = vld [vmem:[%s3673_s8 + $0x68] sm:$0xff] (!%p3687_p6)  ;;  %v2862_v31 = vld [vmem:[#allocation8 + $0x8] sm:$0xff] (!%p3687_p6)  }
  0x62   : > { %2604 = vmatprep.subr.bf16.mxu0 (!%p3687_p6), %v3107_v2  ;;  %534 = vperm.xlu1 (!%p3687_p6), %2860, %v2403_v12   ;;  %v2420_v17 = vld [vmem:[%s3673_s8 + $0x88] sm:$0xff] (!%p3687_p6)  ;;  %v2863_v45 = vld [vmem:[#allocation8 + $0x10] sm:$0xff] (!%p3687_p6)  }
  0x63   : > { %2595 = vmatmul.mubr.msk.bf16.vlgmr.msra.gmra.mrb[0].mxu0 (!%p3687_p6), %vm474_vm1, %v2861_v5  ;;  %v2864_v55 = vld [vmem:[#allocation8 + $0x30] sm:$0xff] (!%p3687_p6)   ;;  %v2865_v6 = vld [vmem:[#allocation8 + $0x38] sm:$0xff] (!%p3687_p6)  }
  0x64   : > { %466 = vperm.xlu0 (!%p3687_p6), %2859, %v458_v7   ;;  %2606 = vmatprep.mubr.msk.bf16.mxu0 (!%p3687_p6), %vm3108_vm0, %v3107_v2 }
  0x66   : > { %539 = vperm.xlu1 %2860, %v2404_v13  }
  0x68   : > { %606 = vperm.xlu0 %2859, %v2407_v8  }
  0x6a   : > { %611 = vperm.xlu1 %2860, %v2408_v14  }
  0x6c   : > { %675 = vperm.xlu0 %2859, %v2411_v9  }
  0x6e   : > { %680 = vperm.xlu1 %2860, %v2412_v15  }
  0x70   : > { %747 = vperm.xlu0 %2859, %v2415_v10  }
  0x72   : > { %752 = vperm.xlu1 %2860, %v2416_v16  }
  0x74   : > { %819 = vperm.xlu0 %2859, %v2419_v11  }
  0x76   : > { %824 = vperm.xlu1 %2860, %v2420_v17  }
  0xdf   : > { %v462_v18 = vpop.permute.xlu0 %461 }
  0xe1   : > { %v535_v32 = vpop.permute.xlu1 %534 }
  0xe3   : > { %v467_v22 = vpop.permute.xlu0 %466 }
  0xe5   : > { %v540_v36 = vpop.permute.xlu1 %539 }
  0xe7   : > { %v607_v46 = vpop.permute.xlu0 %606 }
  0xe9   : > { %v612_v50 = vpop.permute.xlu1 %611 }
  0xeb   : > { %v676_v56 = vpop.permute.xlu0 %675 }
  0xed   : > { %v681_v60 = vpop.permute.xlu1 %680 }
  0xf1   : > { %v753_v10 = vpop.permute.xlu1 %752 }
 0x136   : > { %v512_v19 = vpop.f32.mrb[0].mxu0 }
 0x137   : > { %v513_v20 = vadd.f32 %v512_v19, %v462_v18  ;;  %v2596_v21 = vpop.f32.mrb[1].mxu0  ;;  %v2866_v19 = vld [vmem:[#allocation8 + $0x40] sm:$0xff]  }
 0x138   : > { %v515_v23 = vpop.f32.mrb[2].mxu0  ;;  %v2423_v21 = vld [vmem:[%s3669_s4] ss:$0 sm:$0xff] }
 0x139   : > { %v521_v24 = vmul.f32 0.01, %v513_v20  ;;  %v516_v25 = vadd.f32 %v515_v23, %v467_v22  ;;  %v2597_v26 = vpop.f32.mrb[3].mxu0  ;;  %vm519_vm2 = vcmp.ge.f32.partialorder %v513_v20, 0.0 }
 0x13b   : > { %v522_v27 = vmul.f32 0.01, %v516_v25  ;;  %vm520_vm3 = vcmp.ge.f32.partialorder %v516_v25, 0.0  ;;  %v523_v28 = vsel %vm519_vm2, %v513_v20, %v521_v24 }
 0x13d   : > { %v524_v29 = vsel %vm520_vm3, %v516_v25, %v522_v27  ;;  %v825_v25 = vpop.permute.xlu1 %824 }
 0x13e   : > { %v528_v30 = vpack.c.bf16 %v524_v29, %v523_v28 }
 0x140   : > { %2599 = vmatpush3.bf16.msra.mxu1 %v528_v30 }
 0x141   : > { %2610 = vmatprep.subr.bf16.mxu1 %v3107_v2 }
 0x143   : > { %2601 = vmatmul.mubr.msk.bf16.vlgmr.msra.gmra.mrb[0].mxu1 %vm474_vm1, %v2862_v31 }
 0x144   : > { %2612 = vmatprep.mubr.msk.bf16.mxu1 %vm3108_vm0, %v3107_v2 }
 0x216   : > { %v584_v33 = vpop.f32.mrb[0].mxu1 }
 0x217   : > { %v585_v34 = vadd.f32 %v584_v33, %v535_v32  ;;  %v2602_v35 = vpop.f32.mrb[1].mxu1 }
 0x218   : > { %v587_v37 = vpop.f32.mrb[2].mxu1 }
 0x219   : > { %v593_v38 = vmul.f32 0.01, %v585_v34  ;;  %v588_v39 = vadd.f32 %v587_v37, %v540_v36  ;;  %v2603_v40 = vpop.f32.mrb[3].mxu1  ;;  %vm591_vm4 = vcmp.ge.f32.partialorder %v585_v34, 0.0 }
 0x21b   : > { %vm592_vm5 = vcmp.ge.f32.partialorder %v588_v39, 0.0  ;;  %v594_v41 = vmul.f32 0.01, %v588_v39  ;;  %v595_v42 = vsel %vm591_vm4, %v585_v34, %v593_v38 }
 0x21d   : > { %v596_v43 = vsel %vm592_vm5, %v588_v39, %v594_v41 }
 0x21e   : > { %v600_v44 = vpack.c.bf16 %v596_v43, %v595_v42 }
 0x220   : > { %2605 = vmatpush3.bf16.msra.mxu0 %v600_v44 }
 0x221   : > { %2616 = vmatprep.subr.bf16.mxu0 %v3107_v2 }
 0x223   : > { %2607 = vmatmul.mubr.msk.bf16.vlgmr.msra.gmra.mrb[4].mxu0 %vm474_vm1, %v2863_v45 }
 0x224   : > { %2618 = vmatprep.mubr.msk.bf16.mxu0 %vm3108_vm0, %v3107_v2 }
 0x2f6   : > { %v656_v47 = vpop.f32.mrb[4].mxu0 }
 0x2f7   : > { %v657_v48 = vadd.f32 %v656_v47, %v607_v46  ;;  %v2608_v49 = vpop.f32.mrb[5].mxu0 }
 0x2f8   : > { %v659_v51 = vpop.f32.mrb[6].mxu0 }
 0x2f9   : > { %663 = vst [vmem:[#allocation2] sm:$0xff] %v657_v48  ;;  %v660_v52 = vadd.f32 %v659_v51, %v612_v50  ;;  %v2609_v53 = vpop.f32.mrb[7].mxu0 }
 0x2fb   : > { %664 = vst [vmem:[#allocation2 + $0x8] sm:$0xff] %v660_v52  ;;  %v669_v54 = vpack.c.bf16 %v660_v52, %v657_v48 }
 0x2fd   : > { %2611 = vmatpush3.bf16.msra.mxu1 %v669_v54 }
 0x2fe   : > { %2622 = vmatprep.subr.bf16.mxu1 %v3107_v2 }
 0x300   : > { %2613 = vmatmul.mubr.msk.bf16.vlgmr.msra.gmra.mrb[4].mxu1 %vm474_vm1, %v2864_v55 }
 0x301   : > { %2624 = vmatprep.mubr.msk.bf16.mxu1 %vm3108_vm0, %v3107_v2  ;;  %v748_v2 = vpop.permute.xlu0 %747 }
 0x305   : > { %v820_v20 = vpop.permute.xlu0 %819 }
 0x3d3   : > { %v725_v57 = vpop.f32.mrb[4].mxu1 }
 0x3d4   : > { %v726_v58 = vadd.f32 %v725_v57, %v676_v56  ;;  %v2614_v59 = vpop.f32.mrb[5].mxu1 }
 0x3d5   : > { %v728_v61 = vpop.f32.mrb[6].mxu1 }
 0x3d6   : > { %v734_v62 = vmul.f32 0.01, %v726_v58  ;;  %v729_v63 = vadd.f32 %v728_v61, %v681_v60  ;;  %v2615_v0 = vpop.f32.mrb[7].mxu1  ;;  %vm732_vm6 = vcmp.ge.f32.partialorder %v726_v58, 0.0 }
 0x3d8   : > { %vm733_vm7 = vcmp.ge.f32.partialorder %v729_v63, 0.0  ;;  %v735_v1 = vmul.f32 0.01, %v729_v63  ;;  %v736_v3 = vsel %vm732_vm6, %v726_v58, %v734_v62 }
 0x3da   : > { %v737_v4 = vsel %vm733_vm7, %v729_v63, %v735_v1 }
 0x3db   : > { %v741_v5 = vpack.c.bf16 %v737_v4, %v736_v3 }
 0x3dd   : > { %2617 = vmatpush3.bf16.msra.mxu0 %v741_v5 }
 0x3e0   : > { %2619 = vmatmul.mubr.msk.bf16.vlgmr.msra.gmra.mrb[8].mxu0 %vm474_vm1, %v2865_v6 }
 0x4b3   : > { %v797_v7 = vpop.f32.mrb[8].mxu0 }
 0x4b4   : > { %v798_v8 = vadd.f32 %v797_v7, %v748_v2  ;;  %v2620_v9 = vpop.f32.mrb[9].mxu0 }
 0x4b5   : > { %v800_v11 = vpop.f32.mrb[10].mxu0 }
 0x4b6   : > { %v806_v12 = vmul.f32 0.01, %v798_v8  ;;  %v801_v13 = vadd.f32 %v800_v11, %v753_v10  ;;  %v2621_v14 = vpop.f32.mrb[11].mxu0  ;;  %vm804_vm8 = vcmp.ge.f32.partialorder %v798_v8, 0.0 }
 0x4b8   : > { %vm805_vm9 = vcmp.ge.f32.partialorder %v801_v13, 0.0  ;;  %v807_v15 = vmul.f32 0.01, %v801_v13  ;;  %v808_v16 = vsel %vm804_vm8, %v798_v8, %v806_v12 }
 0x4ba   : > { %v809_v17 = vsel %vm805_vm9, %v801_v13, %v807_v15 }
 0x4bb   : > { %v813_v18 = vpack.c.bf16 %v809_v17, %v808_v16 }
 0x4bd   : > { %2623 = vmatpush3.bf16.msra.mxu1 %v813_v18 }
 0x4c0   : > { %2625 = vmatmul.mubr.msk.bf16.vlgmr.msra.gmra.mrb[8].mxu1 %vm474_vm1, %v2866_v19 }
 0x593   : > { %v869_v22 = vpop.f32.mrb[8].mxu1 }
 0x594   : > { %v870_v23 = vadd.f32 %v869_v22, %v820_v20  ;;  %v2626_v24 = vpop.f32.mrb[9].mxu1 }
 0x595   : > { %v872_v26 = vpop.f32.mrb[10].mxu1 }
 0x596   : > { %v882_v27 = vmul.f32 %v2423_v21, %v870_v23  ;;  %v873_v28 = vadd.f32 %v872_v26, %v825_v25  ;;  %v2627_v29 = vpop.f32.mrb[11].mxu1 }
 0x598   : > { %884 = vst [vmem:[#allocation9] sm:$0xff] %v882_v27  ;;  %v883_v30 = vmul.f32 %v2423_v21, %v873_v28 }
 0x59a   : > { %885 = vst [vmem:[#allocation9 + $0x8] sm:$0xff] %v883_v30 }
 0x59b PF: > { %v3110_v33 = vmov 0.0   ;;  %vm3111_vm10 = vmmov 0   ;;  %v2424_v35 = vld [vmem:[%s3673_s8 + $0x30] sm:$0xff]  ;;  %v2869_v36 = vld [vmem:[#allocation8 + $0x18] sm:$0xff]   ;;  %v3112_v37 = vmov 0   ;;  %vm910_vm11 = vcmask 130048  }
 0x59c   : > { %2628 = vmatprep.subr.bf16.mxu1 %v3110_v33  ;;  %2630 = vmatprep.mubr.msk.bf16.mxu1 %vm3111_vm10, %v3110_v33  ;;  %v2425_v38 = vld [vmem:[%s3673_s8 + $0x38] sm:$0xff]  ;;  %v2432_v39 = vld [vmem:[%s3673_s8 + $0x50] sm:$0xff]  ;;  %v2444_v40 = vld [vmem:[%s3673_s8 + $0x60] sm:$0xff]  ;;  %p2465_p10 = scmp.ne.s32.totalorder %s3187_s18, 1 }
 0x59d   : > { %2867 = vset.pattern.permute.xlu0 %v3112_v37  ;;  %2868 = vset.pattern.permute.xlu1 %v3112_v37  ;;  %v2448_v41 = vld [vmem:[%s3673_s8 + $0x70] sm:$0xff]  ;;  %v2452_v42 = vld [vmem:[%s3673_s8 + $0x80] sm:$0xff]  ;;  %v2429_v44 = vld [vmem:[%s3673_s8 + $0x48] sm:$0xff]  ;;  %vm3114_vm4 = vmmov (!%p2465_p10), 0  }
 0x59e   : > { %897 = vperm.xlu0 %2867, %v2424_v35   ;;  %2666 = vmatprep.subr.bf16.mxu0 %v3110_v33  ;;  %v2428_v43 = vld [vmem:[%s3673_s8 + $0x40] sm:$0xff]  ;;  %v2433_v45 = vld [vmem:[%s3673_s8 + $0x58] sm:$0xff]  ;;  %v2445_v46 = vld [vmem:[%s3673_s8 + $0x68] sm:$0xff] }
 0x59f   : > { %v3388_v31 = vld [vmem:[#allocation9] sm:$0xff]  ;;  %2668 = vmatprep.mubr.msk.bf16.mxu0 %vm3111_vm10, %v3110_v33  ;;  %970 = vperm.xlu1 %2868, %v2428_v43   ;;  %v2449_v47 = vld [vmem:[%s3673_s8 + $0x78] sm:$0xff]  ;;  %v2453_v48 = vld [vmem:[%s3673_s8 + $0x88] sm:$0xff] }
 0x5a0   : > { %v2870_v62 = vld [vmem:[#allocation8 + $0x20] sm:$0xff]   ;;  %v2871_v12 = vld [vmem:[#allocation8 + $0x28] sm:$0xff]   ;;  %v2872_v13 = vld [vmem:[%s3310_s28] sm:$0xff]  }
 0x5a1   : > { %v3390_v32 = vld [vmem:[#allocation9 + $0x8] sm:$0xff]  ;;  %v2873_v14 = vld [vmem:[%s3310_s28 + $0x8] sm:$0xff]   ;;  %v2874_v15 = vld [vmem:[%s3310_s28 + $0x10] sm:$0xff]  }
 0x5a2   : > { %v891_v34 = vpack.c.bf16 %v3390_v32, %v3388_v31  ;;  %902 = vperm.xlu0 %2867, %v2425_v38   ;;  %v2875_v16 = vld [vmem:[%s3310_s28 + $0x18] sm:$0xff]   ;;  %v2876_v17 = vld [vmem:[%s3310_s28 + $0x20] sm:$0xff]   ;;  %v2877_v18 = vld [vmem:[%s3310_s28 + $0x28] sm:$0xff]  }
 0x5a3   : > { %975 = vperm.xlu1 %2868, %v2429_v44   ;;  %v2878_v19 = vld [vmem:[%s3310_s28 + $0x30] sm:$0xff]   ;;  %v2879_v20 = vld [vmem:[%s3310_s28 + $0x38] sm:$0xff]   ;;  %v2880_v38 = vld [vmem:[#allocation8 + $0x30] sm:$0xff]  }
 0x5a4   : > { %2629 = vmatpush3.bf16.msra.mxu1 %v891_v34 }
 0x5a5   : > { %2634 = vmatprep.subr.bf16.mxu1 %v3110_v33 }
 0x5a6   : > { %1042 = vperm.xlu0 %2867, %v2432_v39  }
 0x5a7   : > { %2631 = vmatmul.mubr.msk.bf16.vlgmr.msra.gmra.mrb[0].mxu1 %vm910_vm11, %v2869_v36  ;;  %1047 = vperm.xlu1 %2868, %v2433_v45  }
 0x5a8   : > { %2636 = vmatprep.mubr.msk.bf16.mxu1 %vm3111_vm10, %v3110_v33 }
 0x5aa   : > { %1214 = vperm.xlu0 %2867, %v2444_v40  }
 0x5ab   : > { %1219 = vperm.xlu1 %2868, %v2445_v46  }
 0x5ae   : > { %1286 = vperm.xlu0 %2867, %v2448_v41  }
 0x5af   : > { %1291 = vperm.xlu1 %2868, %v2449_v47  }
 0x5b2   : > { %1358 = vperm.xlu0 %2867, %v2452_v42  }
 0x5b3   : > { %1363 = vperm.xlu1 %2868, %v2453_v48  }
 0x61d   : > { %v898_v49 = vpop.permute.xlu0 %897 }
 0x61e   : > { %v971_v63 = vpop.permute.xlu1 %970 }
 0x621   : > { %v903_v53 = vpop.permute.xlu0 %902 }
 0x622   : > { %v976_v4 = vpop.permute.xlu1 %975 }
 0x625   : > { %v1043_v22 = vpop.permute.xlu0 %1042 }
 0x626   : > { %v1048_v24 = vpop.permute.xlu1 %1047 }
 0x629   : > { %v1215_v39 = vpop.permute.xlu0 %1214 }
 0x62a   : > { %v1220_v43 = vpop.permute.xlu1 %1219 }
 0x67a   : > { %v948_v50 = vpop.f32.mrb[0].mxu1 }
 0x67b   : > { %v949_v51 = vadd.f32 %v948_v50, %v898_v49  ;;  %v2632_v52 = vpop.f32.mrb[1].mxu1 }
 0x67c   : > { %v951_v54 = vpop.f32.mrb[2].mxu1  ;;  %v2881_v52 = vld [vmem:[#allocation8 + $0x38] sm:$0xff]  }
 0x67d   : > { %v957_v55 = vmul.f32 0.01, %v949_v51  ;;  %v952_v56 = vadd.f32 %v951_v54, %v903_v53  ;;  %v2633_v57 = vpop.f32.mrb[3].mxu1  ;;  %vm955_vm12 = vcmp.ge.f32.partialorder %v949_v51, 0.0  ;;  %v1287_v53 = vpop.permute.xlu0 %1286 }
 0x67e   : > { %v1292_v57 = vpop.permute.xlu1 %1291 }
 0x67f   : > { %vm956_vm13 = vcmp.ge.f32.partialorder %v952_v56, 0.0  ;;  %v958_v58 = vmul.f32 0.01, %v952_v56  ;;  %v959_v59 = vsel %vm955_vm12, %v949_v51, %v957_v55 }
 0x681   : > { %v960_v60 = vsel %vm956_vm13, %v952_v56, %v958_v58 }
 0x682   : > { %v964_v61 = vpack.c.bf16 %v960_v60, %v959_v59 }
 0x684   : > { %2635 = vmatpush3.bf16.msra.mxu1 %v964_v61 }
 0x685   : > { %2640 = vmatprep.subr.bf16.mxu1 %v3110_v33 }
 0x687   : > { %2637 = vmatmul.mubr.msk.bf16.vlgmr.msra.gmra.mrb[4].mxu1 %vm910_vm11, %v2870_v62 }
 0x688   : > { %2642 = vmatprep.mubr.msk.bf16.mxu1 %vm3111_vm10, %v3110_v33 }
 0x75a   : > { %v1020_v0 = vpop.f32.mrb[4].mxu1 }
 0x75b   : > { %v1021_v1 = vadd.f32 %v1020_v0, %v971_v63  ;;  %v2638_v3 = vpop.f32.mrb[5].mxu1 }
 0x75c   : > { %v1023_v5 = vpop.f32.mrb[6].mxu1  ;;  %v2882_v3 = vld [vmem:[#allocation8 + $0x40] sm:$0xff]  }
 0x75d   : > { %v1029_v6 = vmul.f32 0.01, %v1021_v1  ;;  %v1024_v2 = vadd.f32 %v1023_v5, %v976_v4  ;;  %v2639_v7 = vpop.f32.mrb[7].mxu1  ;;  %vm1027_vm14 = vcmp.ge.f32.partialorder %v1021_v1, 0.0  ;;  %v2883_v4 = vld [vmem:[%s3315_s12] sm:$0xff]   ;;  %v2884_v5 = vld [vmem:[%s3315_s12 + $0x8] sm:$0xff]  }
 0x75e   : > { %v2887_v7 = vld [vmem:[%s3315_s12 + $0x20] sm:$0xff]  }
 0x75f   : > { %vm1028_vm15 = vcmp.ge.f32.partialorder %v1024_v2, 0.0  ;;  %v1030_v8 = vmul.f32 0.01, %v1024_v2  ;;  %v1031_v9 = vsel %vm1027_vm14, %v1021_v1, %v1029_v6  ;;  %v2885_v6 = vld [vmem:[%s3315_s12 + $0x10] sm:$0xff]  }
 0x761   : > { %v1032_v10 = vsel %vm1028_vm15, %v1024_v2, %v1030_v8  ;;  %v2886_v2 = vld [vmem:[%s3315_s12 + $0x18] sm:$0xff]   ;;  %v2888_v8 = vld [vmem:[%s3315_s12 + $0x28] sm:$0xff]  }
 0x762   : > { %v1036_v11 = vpack.c.bf16 %v1032_v10, %v1031_v9  ;;  %v2889_v9 = vld [vmem:[%s3315_s12 + $0x30] sm:$0xff]   ;;  %v2890_v10 = vld [vmem:[%s3315_s12 + $0x38] sm:$0xff]  }
 0x764   : > { %2641 = vmatpush3.bf16.msra.mxu1 %v1036_v11 }
 0x765   : > { %2646 = vmatprep.subr.bf16.mxu1 %v3110_v33 }
 0x767   : > { %2643 = vmatmul.mubr.msk.bf16.vlgmr.msra.gmra.mrb[8].mxu1 %vm910_vm11, %v2871_v12  ;;  %v1359_v12 = vpop.permute.xlu0 %1358 }
 0x768   : > { %2647 = vmatpush3.bf16.msra.mxu1 %v2872_v13  ;;  %2662 = vmatprep.mubr.msk.bf16.mxu1 %vm3111_vm10, %v3110_v33 }
 0x769   : > { %2648 = vmatprep.subr.bf16.mxu1 %v3110_v33 }
 0x76c   : > { %2649 = vmatpush3.bf16.msra.mxu1 %v2873_v14  ;;  %v1364_v14 = vpop.permute.xlu1 %1363 }
 0x76d   : > { %2650 = vmatprep.subr.bf16.mxu1 %v3110_v33 }
 0x770   : > { %2651 = vmatpush3.bf16.msra.mxu1 %v2874_v15 }
 0x771   : > { %2652 = vmatprep.subr.bf16.mxu1 %v3110_v33 }
 0x774   : > { %2653 = vmatpush3.bf16.msra.mxu1 %v2875_v16 }
 0x775   : > { %2654 = vmatprep.subr.bf16.mxu1 %v3110_v33 }
 0x778   : > { %2655 = vmatpush3.bf16.msra.mxu1 %v2876_v17 }
 0x779   : > { %2656 = vmatprep.subr.bf16.mxu1 %v3110_v33 }
 0x77c   : > { %2657 = vmatpush3.bf16.msra.mxu1 %v2877_v18 }
 0x77d   : > { %2658 = vmatprep.subr.bf16.mxu1 %v3110_v33 }
 0x780   : > { %2659 = vmatpush3.bf16.msra.mxu1 %v2878_v19 }
 0x781   : > { %2660 = vmatprep.subr.bf16.mxu1 %v3110_v33 }
 0x784   : > { %2661 = vmatpush3.bf16.msra.mxu1 %v2879_v20  ;;  %v1521_v20 = vld [vmem:[#allocation2] sm:$0xff] }
 0x83a   : > { %v1092_v21 = vpop.f32.mrb[8].mxu1 }
 0x83b   : > { %v2644_v23 = vpop.f32.mrb[9].mxu1  ;;  %v1093_v26 = vadd.f32 %v1092_v21, %v1043_v22  ;;  %v1522_v22 = vld [vmem:[#allocation2 + $0x8] sm:$0xff] }
 0x83c   : > { %v1095_v25 = vpop.f32.mrb[10].mxu1 }
 0x83d   : > { %v1096_v27 = vadd.f32 %v1095_v25, %v1048_v24  ;;  %v2645_v28 = vpop.f32.mrb[11].mxu1 }
 0x83f   : > { %v1099_v29 = vpack.c.bf16 %v1096_v27, %v1093_v26 }
 0x841   : > { %2663 = vmatmul.mubr.bf16.vlgmr.msra.gmra.mrb[12].mxu1 %v1099_v29 }
 0x914   : > { %v1198_v30 = vpop.f32.mrb[12].mxu1 }
 0x915   : > { %v2664_v34 = vpop.f32.mrb[13].mxu1 }
 0x916   : > { %v1201_v35 = vpop.f32.mrb[14].mxu1 }
 0x917   : > { %v1208_v36 = vpack.c.bf16 %v1201_v35, %v1198_v30  ;;  %v2665_v37 = vpop.f32.mrb[15].mxu1 }
 0x919   : > { %2667 = vmatpush3.bf16.msra.mxu0 %v1208_v36 }
 0x91a   : > { %2672 = vmatprep.subr.bf16.mxu0 %v3110_v33 }
 0x91c   : > { %2669 = vmatmul.mubr.msk.bf16.vlgmr.msra.gmra.mrb[0].mxu0 %vm910_vm11, %v2880_v38 }
 0x91d   : > { %2674 = vmatprep.mubr.msk.bf16.mxu0 %vm3111_vm10, %v3110_v33 }
 0x9ef   : > { %v1264_v40 = vpop.f32.mrb[0].mxu0 }
 0x9f0   : > { %v1265_v41 = vadd.f32 %v1264_v40, %v1215_v39  ;;  %v2670_v42 = vpop.f32.mrb[1].mxu0  ;;  %v3113_v39 = vmov (!%p2465_p10), 0.0  }
 0x9f1   : > { %v1267_v44 = vpop.f32.mrb[2].mxu0  ;;  %v3115_v42 = vmov (!%p2465_p10), 0   ;;  %2722 = vmatprep.subr.bf16.mxu1 (!%p2465_p10), %v3113_v39  ;;  %2724 = vmatprep.mubr.msk.bf16.mxu1 (!%p2465_p10), %vm3114_vm4, %v3113_v39 }
 0x9f2   : > { %v1273_v45 = vmul.f32 0.01, %v1265_v41  ;;  %v1268_v46 = vadd.f32 %v1267_v44, %v1220_v43  ;;  %v2671_v47 = vpop.f32.mrb[3].mxu0  ;;  %vm1271_vm0 = vcmp.ge.f32.partialorder %v1265_v41, 0.0  ;;  %2891 = vset.pattern.permute.xlu0 (!%p2465_p10), %v3115_v42  ;;  %2892 = vset.pattern.permute.xlu1 (!%p2465_p10), %v3115_v42  ;;  %v2470_v44 = vld [vmem:[%s3673_s8 + $0x90] sm:$0xff] (!%p2465_p10) }
 0x9f3   : > { %1659 = vperm.xlu0 (!%p2465_p10), %2891, %v2470_v44   ;;  %v2894_v47 = vld [vmem:[#allocation8 + $0x48] sm:$0xff] (!%p2465_p10)  }
 0x9f4   : > { %vm1272_vm1 = vcmp.ge.f32.partialorder %v1268_v46, 0.0  ;;  %v1274_v48 = vmul.f32 0.01, %v1268_v46  ;;  %v1275_v49 = vsel %vm1271_vm0, %v1265_v41, %v1273_v45  ;;  %v2893_v41 = vld [vmem:[#allocation8 + $0x50] sm:$0xff] (!%p2465_p10)   ;;  %v2471_v45 = vld [vmem:[%s3673_s8 + $0x98] sm:$0xff] (!%p2465_p10) }
 0x9f6   : > { %v1276_v50 = vsel %vm1272_vm1, %v1268_v46, %v1274_v48  ;;  %v2476_v46 = vld [vmem:[%s3673_s8 + $0xb0] sm:$0xff] (!%p2465_p10)  ;;  %v2488_v48 = vld [vmem:[%s3673_s8 + $0xc0] sm:$0xff] (!%p2465_p10) }
 0x9f7   : > { %v1280_v51 = vpack.c.bf16 %v1276_v50, %v1275_v49  ;;  %1664 = vperm.xlu0 (!%p2465_p10), %2891, %v2471_v45   ;;  %v2492_v49 = vld [vmem:[%s3673_s8 + $0xd0] sm:$0xff] (!%p2465_p10)  ;;  %v2496_v50 = vld [vmem:[%s3673_s8 + $0xe0] sm:$0xff] (!%p2465_p10) }
 0x9f9   : > { %2673 = vmatpush3.bf16.msra.mxu0 %v1280_v51  ;;  %v2472_v51 = vld [vmem:[%s3673_s8 + $0xa0] sm:$0xff] (!%p2465_p10) }
 0x9fa   : > { %2678 = vmatprep.subr.bf16.mxu0 %v3110_v33  ;;  %1684 = vperm.xlu1 (!%p2465_p10), %2892, %v2472_v51  }
 0x9fb   : > { %1756 = vperm.xlu0 (!%p2465_p10), %2891, %v2476_v46  }
 0x9fc   : > { %2675 = vmatmul.mubr.msk.bf16.vlgmr.msra.gmra.mrb[4].mxu0 %vm910_vm11, %v2881_v52  ;;  %v2473_v52 = vld [vmem:[%s3673_s8 + $0xa8] sm:$0xff] (!%p2465_p10) }
 0x9fd   : > { %2680 = vmatprep.mubr.msk.bf16.mxu0 %vm3111_vm10, %v3110_v33 }
 0x9fe   : > { %1689 = vperm.xlu1 (!%p2465_p10), %2892, %v2473_v52  }
 0x9ff   : > { %1930 = vperm.xlu0 (!%p2465_p10), %2891, %v2488_v48  }
 0xa03   : > { %2002 = vperm.xlu0 (!%p2465_p10), %2891, %v2492_v49  }
 0xa07   : > { %2074 = vperm.xlu0 (!%p2465_p10), %2891, %v2496_v50   ;;  %v2905_v50 = vld [vmem:[#allocation8 + $0x68] sm:$0xff] (!%p2465_p10)  }
 0xacf   : > { %v1336_v54 = vpop.f32.mrb[4].mxu0 }
 0xad0   : > { %v1337_v55 = vadd.f32 %v1336_v54, %v1287_v53  ;;  %v2676_v56 = vpop.f32.mrb[5].mxu0  ;;  %v2477_v53 = vld [vmem:[%s3673_s8 + $0xb8] sm:$0xff] (!%p2465_p10)  ;;  %v2489_v54 = vld [vmem:[%s3673_s8 + $0xc8] sm:$0xff] (!%p2465_p10) }
 0xad1   : > { %v1339_v58 = vpop.f32.mrb[6].mxu0  ;;  %1761 = vperm.xlu1 (!%p2465_p10), %2892, %v2477_v53   ;;  %v2497_v56 = vld [vmem:[%s3673_s8 + $0xe8] sm:$0xff] (!%p2465_p10) }
 0xad2   : > { %v1345_v59 = vmul.f32 0.01, %v1337_v55  ;;  %v1340_v60 = vadd.f32 %v1339_v58, %v1292_v57  ;;  %v2677_v61 = vpop.f32.mrb[7].mxu0  ;;  %vm1343_vm2 = vcmp.ge.f32.partialorder %v1337_v55, 0.0 }
 0xad3   : > { %v1660_v61 = vpop.permute.xlu0 (!%p2465_p10), %1659 }
 0xad4   : > { %vm1344_vm3 = vcmp.ge.f32.partialorder %v1340_v60, 0.0  ;;  %v1346_v62 = vmul.f32 0.01, %v1340_v60  ;;  %v1347_v63 = vsel %vm1343_vm2, %v1337_v55, %v1345_v59  ;;  %v2493_v55 = vld [vmem:[%s3673_s8 + $0xd8] sm:$0xff] (!%p2465_p10) }
 0xad5   : > { %1935 = vperm.xlu1 (!%p2465_p10), %2892, %v2489_v54  }
 0xad6   : > { %v1348_v0 = vsel %vm1344_vm3, %v1340_v60, %v1346_v62 }
 0xad7   : > { %v1352_v1 = vpack.c.bf16 %v1348_v0, %v1347_v63 }
 0xad9   : > { %2679 = vmatpush3.bf16.msra.mxu0 %v1352_v1  ;;  %2007 = vperm.xlu1 (!%p2465_p10), %2892, %v2493_v55  }
 0xada   : > { %2684 = vmatprep.subr.bf16.mxu0 %v3110_v33 }
 0xadc   : > { %2681 = vmatmul.mubr.msk.bf16.vlgmr.msra.gmra.mrb[8].mxu0 %vm910_vm11, %v2882_v3 }
 0xadd   : > { %2685 = vmatpush3.bf16.msra.mxu0 %v2883_v4  ;;  %2700 = vmatprep.mubr.msk.bf16.mxu0 %vm3111_vm10, %v3110_v33 }
 0xade   : > { %2686 = vmatprep.subr.bf16.mxu0 %v3110_v33  ;;  %2079 = vperm.xlu1 (!%p2465_p10), %2892, %v2497_v56  }
 0xae1   : > { %2687 = vmatpush3.bf16.msra.mxu0 %v2884_v5 }
 0xae2   : > { %2688 = vmatprep.subr.bf16.mxu0 %v3110_v33 }
 0xae5   : > { %2689 = vmatpush3.bf16.msra.mxu0 %v2885_v6  ;;  %v1665_v6 = vpop.permute.xlu0 (!%p2465_p10), %1664 }
 0xae6   : > { %2690 = vmatprep.subr.bf16.mxu0 %v3110_v33 }
 0xae9   : > { %2691 = vmatpush3.bf16.msra.mxu0 %v2886_v2 }
 0xaea   : > { %2692 = vmatprep.subr.bf16.mxu0 %v3110_v33 }
 0xaed   : > { %2693 = vmatpush3.bf16.msra.mxu0 %v2887_v7 }
 0xaee   : > { %2694 = vmatprep.subr.bf16.mxu0 %v3110_v33 }
 0xaf1   : > { %2695 = vmatpush3.bf16.msra.mxu0 %v2888_v8 }
 0xaf2   : > { %2696 = vmatprep.subr.bf16.mxu0 %v3110_v33 }
 0xaf5   : > { %2697 = vmatpush3.bf16.msra.mxu0 %v2889_v9 }
 0xaf6   : > { %2698 = vmatprep.subr.bf16.mxu0 %v3110_v33  ;;  %v2464_v33 = vld [vmem:[%s446_s20] ss:$0 sm:$0xff] }
 0xaf9   : > { %2699 = vmatpush3.bf16.msra.mxu0 %v2890_v10 }
 0xafa   : > { %2704 = vmatprep.subr.bf16.mxu0 (!%p2465_p10), %v3113_v39 }
 0xbaf   : > { %v1408_v11 = vpop.f32.mrb[8].mxu0 }
 0xbb0   : > { %v2682_v13 = vpop.f32.mrb[9].mxu0  ;;  %v1409_v16 = vadd.f32 %v1408_v11, %v1359_v12  ;;  %v2895_v12 = vld [vmem:[#allocation8 + $0x58] sm:$0xff] (!%p2465_p10)  }
 0xbb1   : > { %v1411_v15 = vpop.f32.mrb[10].mxu0  ;;  %v2897_v13 = vld [vmem:[#allocation3] sm:$0xff] (!%p2465_p10)  }
 0xbb2   : > { %v1412_v17 = vadd.f32 %v1411_v15, %v1364_v14  ;;  %v2683_v18 = vpop.f32.mrb[11].mxu0  ;;  %v2898_v14 = vld [vmem:[#allocation3 + $0x8] sm:$0xff] (!%p2465_p10)   ;;  %v2899_v15 = vld [vmem:[#allocation3 + $0x10] sm:$0xff] (!%p2465_p10)  }
 0xbb3   : > { %v2902_v18 = vld [vmem:[#allocation3 + $0x28] sm:$0xff] (!%p2465_p10)  }
 0xbb4   : > { %v1415_v19 = vpack.c.bf16 %v1412_v17, %v1409_v16  ;;  %v2900_v16 = vld [vmem:[#allocation3 + $0x18] sm:$0xff] (!%p2465_p10)   ;;  %v2901_v17 = vld [vmem:[#allocation3 + $0x20] sm:$0xff] (!%p2465_p10)  }
 0xbb6   : > { %2701 = vmatmul.mubr.bf16.vlgmr.msra.gmra.mrb[12].mxu0 %v1415_v19  ;;  %v1685_v19 = vpop.permute.xlu1 (!%p2465_p10), %1684 }
 0xbb7   : > { %2706 = vmatprep.mubr.msk.bf16.mxu0 (!%p2465_p10), %vm3114_vm4, %v3113_v39 }
 0xc89   : > { %v1514_v21 = vpop.f32.mrb[12].mxu0 }
 0xc8a   : > { %v1523_v23 = vadd.f32 %v1521_v20, %v1514_v21  ;;  %v2702_v24 = vpop.f32.mrb[13].mxu0 }
 0xc8b   : > { %v1517_v25 = vpop.f32.mrb[14].mxu0 }
 0xc8c   : > { %v1526_v26 = vsub.f32 %v1523_v23, %v3388_v31  ;;  %v1524_v27 = vadd.f32 %v1522_v22, %v1517_v25  ;;  %v2703_v28 = vpop.f32.mrb[15].mxu0  ;;  %v1690_v23 = vpop.permute.xlu1 (!%p2465_p10), %1689 }
 0xc8e   : > { %v1534_v29 = vmul.f32 %v2464_v33, %v1526_v26  ;;  %v1527_v30 = vsub.f32 %v1524_v27, %v3390_v32  ;;  %1543 = sbr.rel (%p2465_p10) target bundleno = 5009 (0x1391), region = 76 }
 0xc90   : > { %v1536_v34 = vadd.f32 %v1534_v29, %v3388_v31  ;;  %v1535_v35 = vmul.f32 %v2464_v33, %v1527_v30  ;;  %v1546_v31 = vld [vmem:[%s3665_s0] sm:$0xff] (!%p2465_p10) }
 0xc92   : > { %1538 = vst [vmem:[#allocation9] sm:$0xff] %v1536_v34  ;;  %v1537_v36 = vadd.f32 %v1535_v35, %v3390_v32  ;;  %v1547_v32 = vld [vmem:[%s3665_s0 + $0x8] sm:$0xff] (!%p2465_p10)  ;;  %v2896_v34 = vld [vmem:[#allocation8 + $0x60] sm:$0xff] (!%p2465_p10)   ;;  %v2903_v35 = vld [vmem:[#allocation3 + $0x30] sm:$0xff] (!%p2465_p10)  }
 0xc93   : > { %v1551_v43 = vpack.c.bf16 (!%p2465_p10), %v1547_v32, %v1546_v31 }
 0xc94   : > { %1539 = vst [vmem:[#allocation9 + $0x8] sm:$0xff] %v1537_v36  ;;  %v2904_v36 = vld [vmem:[#allocation3 + $0x38] sm:$0xff] (!%p2465_p10)  }
 0xc99   : > { %v1544_v37 = vld [vmem:[#allocation9] sm:$0xff] }
 0xc9b   : > { %v1545_v38 = vld [vmem:[#allocation9 + $0x8] sm:$0xff] }
 0xc9c   : > { %v1555_v40 = vpack.c.bf16 %v1545_v38, %v1544_v37  ;;  %v1757_v38 = vpop.permute.xlu0 %1756 }
 0xc9e   : > { %2705 = vmatpush3.bf16.msra.mxu0 %v1555_v40 }
 0xc9f   : > { %2710 = vmatprep.subr.bf16.mxu0 %v3113_v39 }
 0xca0   : > { %v1931_v51 = vpop.permute.xlu0 %1930 }
 0xca1   : > { %2707 = vmatmul.mubr.msk.bf16.vlgmr.msra.gmra.mrb[0].mxu0 %vm910_vm11, %v2893_v41  ;;  %v1762_v41 = vpop.permute.xlu1 %1761 }
 0xca2   : > { %2711 = vmatpush3.bf16.msra.mxu0 %v1551_v43  ;;  %2712 = vmatprep.mubr.msk.bf16.mxu0 %vm3114_vm4, %v3113_v39 }
 0xca3   : > { %2716 = vmatprep.subr.bf16.mxu0 %v3113_v39 }
 0xca5   : > { %v1936_v55 = vpop.permute.xlu1 %1935 }
 0xca9   : > { %2713 = vmatmul.mubr.msk.bf16.vlgmr.msra.gmra.mrb[4].mxu0 %vm910_vm11, %v2894_v47 }
 0xcaa   : > { %2718 = vmatprep.mubr.msk.bf16.mxu0 %vm3114_vm4, %v3113_v39 }
 0xd74   : > { %v1598_v57 = vpop.f32.mrb[0].mxu0 }
 0xd75   : > { %v2708_v58 = vpop.f32.mrb[1].mxu0 }
 0xd76   : > { %v1601_v59 = vpop.f32.mrb[2].mxu0 }
 0xd77   : > { %v2709_v60 = vpop.f32.mrb[3].mxu0 }
 0xd7c   : > { %v1647_v62 = vpop.f32.mrb[4].mxu0 }
 0xd7d   : > { %v1648_v63 = vadd.f32 %v1647_v62, %v1598_v57  ;;  %v2714_v0 = vpop.f32.mrb[5].mxu0 }
 0xd7e   : > { %v1650_v1 = vpop.f32.mrb[6].mxu0  ;;  %v2906_v0 = vld [vmem:[#allocation8 + $0x70] sm:$0xff]  }
 0xd7f   : > { %v1667_v3 = vadd.f32 %v1660_v61, %v1648_v63  ;;  %v1651_v4 = vadd.f32 %v1650_v1, %v1601_v59  ;;  %v2715_v5 = vpop.f32.mrb[7].mxu0  ;;  %v2003_v1 = vpop.permute.xlu0 %2002 }
 0xd81   : > { %v1671_v2 = vmul.f32 0.01, %v1667_v3  ;;  %v1668_v7 = vadd.f32 %v1665_v6, %v1651_v4  ;;  %vm1669_vm5 = vcmp.ge.f32.partialorder %v1667_v3, 0.0  ;;  %v2008_v6 = vpop.permute.xlu1 %2007 }
 0xd83   : > { %vm1670_vm6 = vcmp.ge.f32.partialorder %v1668_v7, 0.0  ;;  %v1672_v8 = vmul.f32 0.01, %v1668_v7  ;;  %v1673_v9 = vsel %vm1669_vm5, %v1667_v3, %v1671_v2 }
 0xd85   : > { %v1674_v10 = vsel %vm1670_vm6, %v1668_v7, %v1672_v8 }
 0xd86   : > { %v1678_v11 = vpack.c.bf16 %v1674_v10, %v1673_v9 }
 0xd88   : > { %2717 = vmatpush3.bf16.msra.mxu0 %v1678_v11 }
 0xd89   : > { %2728 = vmatprep.subr.bf16.mxu0 %v3113_v39 }
 0xd8b   : > { %2719 = vmatmul.mubr.msk.bf16.vlgmr.msra.gmra.mrb[8].mxu0 %vm910_vm11, %v2895_v12 }
 0xd8c   : > { %2744 = vmatprep.mubr.msk.bf16.mxu0 %vm3114_vm4, %v3113_v39  ;;  %2729 = vmatpush3.bf16.msra.mxu0 %v2897_v13 }
 0xd8d   : > { %2730 = vmatprep.subr.bf16.mxu0 %v3113_v39 }
 0xd90   : > { %2731 = vmatpush3.bf16.msra.mxu0 %v2898_v14  ;;  %v2907_v14 = vld [vmem:[#allocation8 + $0x78] sm:$0xff]  }
 0xd91   : > { %2732 = vmatprep.subr.bf16.mxu0 %v3113_v39 }
 0xd94   : > { %2733 = vmatpush3.bf16.msra.mxu0 %v2899_v15  ;;  %v2908_v15 = vld [vmem:[#allocation6] sm:$0xff]  }
 0xd95   : > { %2734 = vmatprep.subr.bf16.mxu0 %v3113_v39 }
 0xd98   : > { %2735 = vmatpush3.bf16.msra.mxu0 %v2900_v16  ;;  %v2909_v16 = vld [vmem:[#allocation6 + $0x8] sm:$0xff]  }
 0xd99   : > { %2736 = vmatprep.subr.bf16.mxu0 %v3113_v39 }
 0xd9c   : > { %2737 = vmatpush3.bf16.msra.mxu0 %v2901_v17  ;;  %v2910_v17 = vld [vmem:[#allocation6 + $0x10] sm:$0xff]  }
 0xd9d   : > { %2738 = vmatprep.subr.bf16.mxu0 %v3113_v39 }
 0xda0   : > { %2739 = vmatpush3.bf16.msra.mxu0 %v2902_v18  ;;  %v2911_v18 = vld [vmem:[#allocation6 + $0x18] sm:$0xff]  }
 0xda1   : > { %2740 = vmatprep.subr.bf16.mxu0 %v3113_v39 }
 0xda4   : > { %2741 = vmatpush3.bf16.msra.mxu0 %v2903_v35 }
 0xda5   : > { %2742 = vmatprep.subr.bf16.mxu0 %v3113_v39 }
 0xda8   : > { %2743 = vmatpush3.bf16.msra.mxu0 %v2904_v36 }
 0xe5e   : > { %v1734_v20 = vpop.f32.mrb[8].mxu0 }
 0xe5f   : > { %v1735_v21 = vadd.f32 %v1734_v20, %v1685_v19  ;;  %v2720_v22 = vpop.f32.mrb[9].mxu0  ;;  %v2912_v19 = vld [vmem:[#allocation6 + $0x20] sm:$0xff]   ;;  %v2913_v20 = vld [vmem:[#allocation6 + $0x28] sm:$0xff]  }
 0xe60   : > { %v1737_v24 = vpop.f32.mrb[10].mxu0  ;;  %v2915_v22 = vld [vmem:[#allocation6 + $0x38] sm:$0xff]  }
 0xe61   : > { %v1743_v33 = vmul.f32 0.01, %v1735_v21  ;;  %v1738_v25 = vadd.f32 %v1737_v24, %v1690_v23  ;;  %v2721_v26 = vpop.f32.mrb[11].mxu0  ;;  %vm1741_vm7 = vcmp.ge.f32.partialorder %v1735_v21, 0.0  ;;  %v2075_v24 = vpop.permute.xlu0 %2074 }
 0xe63   : > { %v1744_v27 = vmul.f32 0.01, %v1738_v25  ;;  %vm1742_vm8 = vcmp.ge.f32.partialorder %v1738_v25, 0.0  ;;  %v1745_v28 = vsel %vm1741_vm7, %v1735_v21, %v1743_v33  ;;  %v2914_v21 = vld [vmem:[#allocation6 + $0x30] sm:$0xff]  }
 0xe65   : > { %v1746_v29 = vsel %vm1742_vm8, %v1738_v25, %v1744_v27  ;;  %v2080_v25 = vpop.permute.xlu1 %2079 }
 0xe66   : > { %v1750_v30 = vpack.c.bf16 %v1746_v29, %v1745_v28 }
 0xe68   : > { %2723 = vmatpush3.bf16.msra.mxu1 %v1750_v30 }
 0xe69   : > { %2748 = vmatprep.subr.bf16.mxu1 %v3113_v39 }
 0xe6b   : > { %2725 = vmatmul.mubr.msk.bf16.vlgmr.msra.gmra.mrb[0].mxu1 %vm910_vm11, %v2896_v34 }
 0xe6c   : > { %2750 = vmatprep.mubr.msk.bf16.mxu1 %vm3114_vm4, %v3113_v39 }
 0xf3e   : > { %v1806_v37 = vpop.f32.mrb[0].mxu1 }
 0xf3f   : > { %v2726_v40 = vpop.f32.mrb[1].mxu1  ;;  %v1807_v32 = vadd.f32 %v1806_v37, %v1757_v38 }
 0xf40   : > { %v1809_v31 = vpop.f32.mrb[2].mxu1 }
 0xf41   : > { %v1810_v42 = vadd.f32 %v1809_v31, %v1762_v41  ;;  %v2727_v43 = vpop.f32.mrb[3].mxu1 }
 0xf43   : > { %v1813_v44 = vpack.c.bf16 %v1810_v42, %v1807_v32 }
 0xf45   : > { %2745 = vmatmul.mubr.bf16.vlgmr.msra.gmra.mrb[12].mxu0 %v1813_v44 }
0x1018   : > { %v1912_v45 = vpop.f32.mrb[12].mxu0 }
0x1019   : > { %1919 = vst [vmem:[#allocation10] sm:$0xff] %v1912_v45  ;;  %v2746_v46 = vpop.f32.mrb[13].mxu0 }
0x101a   : > { %v1915_v47 = vpop.f32.mrb[14].mxu0 }
0x101b   : > { %1920 = vst [vmem:[#allocation10 + $0x8] sm:$0xff] %v1915_v47  ;;  %v1924_v48 = vpack.c.bf16 %v1915_v47, %v1912_v45  ;;  %v2747_v49 = vpop.f32.mrb[15].mxu0 }
0x101d   : > { %2749 = vmatpush3.bf16.msra.mxu1 %v1924_v48 }
0x101e   : > { %2754 = vmatprep.subr.bf16.mxu1 %v3113_v39 }
0x1020   : > { %2751 = vmatmul.mubr.msk.bf16.vlgmr.msra.gmra.mrb[4].mxu1 %vm910_vm11, %v2905_v50 }
0x1021   : > { %2756 = vmatprep.mubr.msk.bf16.mxu1 %vm3114_vm4, %v3113_v39 }
0x10f3   : > { %v1980_v52 = vpop.f32.mrb[4].mxu1 }
0x10f4   : > { %v1981_v53 = vadd.f32 %v1980_v52, %v1931_v51  ;;  %v2752_v54 = vpop.f32.mrb[5].mxu1 }
0x10f5   : > { %v1983_v56 = vpop.f32.mrb[6].mxu1 }
0x10f6   : > { %v1989_v57 = vmul.f32 0.01, %v1981_v53  ;;  %v1984_v58 = vadd.f32 %v1983_v56, %v1936_v55  ;;  %v2753_v59 = vpop.f32.mrb[7].mxu1  ;;  %vm1987_vm9 = vcmp.ge.f32.partialorder %v1981_v53, 0.0 }
0x10f8   : > { %vm1988_vm10 = vcmp.ge.f32.partialorder %v1984_v58, 0.0  ;;  %v1990_v60 = vmul.f32 0.01, %v1984_v58  ;;  %v1991_v61 = vsel %vm1987_vm9, %v1981_v53, %v1989_v57 }
0x10fa   : > { %v1992_v62 = vsel %vm1988_vm10, %v1984_v58, %v1990_v60 }
0x10fb   : > { %v1996_v63 = vpack.c.bf16 %v1992_v62, %v1991_v61 }
0x10fd   : > { %2755 = vmatpush3.bf16.msra.mxu1 %v1996_v63 }
0x10fe   : > { %2760 = vmatprep.subr.bf16.mxu1 %v3113_v39 }
0x1100   : > { %2757 = vmatmul.mubr.msk.bf16.vlgmr.msra.gmra.mrb[8].mxu1 %vm910_vm11, %v2906_v0 }
0x1101   : > { %2762 = vmatprep.mubr.msk.bf16.mxu1 %vm3114_vm4, %v3113_v39 }
0x11d3   : > { %v2052_v3 = vpop.f32.mrb[8].mxu1 }
0x11d4   : > { %v2053_v4 = vadd.f32 %v2052_v3, %v2003_v1  ;;  %v2758_v5 = vpop.f32.mrb[9].mxu1 }
0x11d5   : > { %v2055_v2 = vpop.f32.mrb[10].mxu1 }
0x11d6   : > { %v2061_v7 = vmul.f32 0.01, %v2053_v4  ;;  %v2056_v8 = vadd.f32 %v2055_v2, %v2008_v6  ;;  %v2759_v9 = vpop.f32.mrb[11].mxu1  ;;  %vm2059_vm12 = vcmp.ge.f32.partialorder %v2053_v4, 0.0 }
0x11d8   : > { %vm2060_vm13 = vcmp.ge.f32.partialorder %v2056_v8, 0.0  ;;  %v2062_v10 = vmul.f32 0.01, %v2056_v8  ;;  %v2063_v11 = vsel %vm2059_vm12, %v2053_v4, %v2061_v7 }
0x11da   : > { %v2064_v12 = vsel %vm2060_vm13, %v2056_v8, %v2062_v10 }
0x11db   : > { %v2068_v13 = vpack.c.bf16 %v2064_v12, %v2063_v11 }
0x11dd   : > { %2761 = vmatpush3.bf16.msra.mxu1 %v2068_v13 }
0x11de   : > { %2766 = vmatprep.subr.bf16.mxu1 %v3113_v39 }
0x11e0   : > { %2763 = vmatmul.mubr.msk.bf16.vlgmr.msra.gmra.mrb[12].mxu1 %vm910_vm11, %v2907_v14 }
0x11e1   : > { %2767 = vmatpush3.bf16.msra.mxu1 %v2908_v15  ;;  %2782 = vmatprep.mubr.msk.bf16.mxu1 %vm3114_vm4, %v3113_v39 }
0x11e2   : > { %2768 = vmatprep.subr.bf16.mxu1 %v3113_v39 }
0x11e5   : > { %2769 = vmatpush3.bf16.msra.mxu1 %v2909_v16 }
0x11e6   : > { %2770 = vmatprep.subr.bf16.mxu1 %v3113_v39 }
0x11e9   : > { %2771 = vmatpush3.bf16.msra.mxu1 %v2910_v17 }
0x11ea   : > { %2772 = vmatprep.subr.bf16.mxu1 %v3113_v39 }
0x11ed   : > { %2773 = vmatpush3.bf16.msra.mxu1 %v2911_v18 }
0x11ee   : > { %2774 = vmatprep.subr.bf16.mxu1 %v3113_v39 }
0x11f1   : > { %2775 = vmatpush3.bf16.msra.mxu1 %v2912_v19 }
0x11f2   : > { %2776 = vmatprep.subr.bf16.mxu1 %v3113_v39 }
0x11f5   : > { %2777 = vmatpush3.bf16.msra.mxu1 %v2913_v20 }
0x11f6   : > { %2778 = vmatprep.subr.bf16.mxu1 %v3113_v39 }
0x11f9   : > { %2779 = vmatpush3.bf16.msra.mxu1 %v2914_v21 }
0x11fa   : > { %2780 = vmatprep.subr.bf16.mxu1 %v3113_v39 }
0x11fd   : > { %2781 = vmatpush3.bf16.msra.mxu1 %v2915_v22 }
0x12b3   : > { %v2124_v23 = vpop.f32.mrb[12].mxu1 }
0x12b4   : > { %v2764_v33 = vpop.f32.mrb[13].mxu1  ;;  %v2125_v27 = vadd.f32 %v2124_v23, %v2075_v24 }
0x12b5   : > { %v2127_v26 = vpop.f32.mrb[14].mxu1 }
0x12b6   : > { %v2128_v28 = vadd.f32 %v2127_v26, %v2080_v25  ;;  %v2765_v29 = vpop.f32.mrb[15].mxu1 }
0x12b8   : > { %v2131_v30 = vpack.c.bf16 %v2128_v28, %v2125_v27 }
0x12ba   : > { %2783 = vmatmul.mubr.bf16.vlgmr.msra.gmra.mrb[16].mxu1 %v2131_v30 }
0x138d   : > { %v2230_v34 = vpop.f32.mrb[16].mxu1 }
0x138e   : > { %2237 = vst [vmem:[#allocation12] sm:$0xff] %v2230_v34  ;;  %v2784_v35 = vpop.f32.mrb[17].mxu1 }
0x138f   : > { %v2233_v36 = vpop.f32.mrb[18].mxu1 }
0x1390   : > { %2238 = vst [vmem:[#allocation12 + $0x8] sm:$0xff] %v2233_v36  ;;  %v2785_v37 = vpop.f32.mrb[19].mxu1 }
0x1391 PF: > { %p2826_p11 = scmp.eq.s32.totalorder %s3187_s18, 1  ;;  %s3116_s29 = smov [#allocation10]  }
0x1392   : > { %s2258_s30 = sshll.u32 %s3116_s29, 4  ;;  %s3117_s14 = smov [#allocation9]   ;;  %s2259_s30 = int_to_ptr.vmem [resolvable:$true] %s2258_s30 }
0x1393   : > { %s2245_s15 = sshll.u32 %s3117_s14, 4  ;;  %s3000_s28 = scalar_lea.vmem %s2259_s30, 256  ;;  %s2246_s15 = int_to_ptr.vmem [resolvable:$true] %s2245_s15 }
0x1394   : > { %p3001_p12 = scmp.ne.s32.totalorder %s2259_s30, %s3000_s28  ;;  %p3007_p1 = scmp.lt.s32.totalorder %s2259_s30, %s2259_s30 }
0x1395   : > { %p3008_p5 = scmp.lt.s32.totalorder %s3000_s28, %s3000_s28 }
0x1396   : > { %p3002_p13 = pnand %p3001_p12, %p2826_p11 }
0x1397   : > { %p3009_p2 = por %p3008_p5, %p3007_p1 }
0x1398   : > { %p3003_p0 = pneg %p3002_p13 }
0x139a   : > { %p3010_p8 = pnand %p3009_p2, %p3003_p0 }
0x139c   : > { %3013 = shalt.err (!%p3010_p8)
}
0x139d   : > { %s3014_s20 = scalar_lea.hbm %s3675_s10, 256 }
0x139e   : > { %p3015_p3 = scmp.ne.s32.totalorder %s3675_s10, %s3014_s20  ;;  %p3020_p9 = scmp.lt.u32.totalorder %s3014_s20, %s3675_s10 }
0x13a0   : > { %p3016_p4 = pnand %p3015_p3, %p2826_p11 }
0x13a2   : > { %p3017_p7 = pneg %p3016_p4 }
0x13a4   : > { %p3022_p6 = pnand %p3020_p9, %p3017_p7 }
0x13a6   : > { %3025 = shalt.err (!%p3022_p6)
}
0x13a7   : > { %s3118_s19 = smov 128   ;;  %s3119_s26 = smov 8  }
0x13a8   : > { %2801 = dma.vmem_to_hbm [thread:$0]  (%p2826_p11), %s2259_s30, 256, %s3675_s10, [#allocation11], %s3118_s19, %s3118_s19, %s3119_s26  }
0x13a9   : > { %s3026_s27 = scalar_lea.vmem %s2246_s15, 256  ;;  %p3033_p0 = scmp.lt.s32.totalorder %s2246_s15, %s2246_s15 }
0x13aa   : > { %p3027_p10 = scmp.ne.s32.totalorder %s2246_s15, %s3026_s27  ;;  %p3034_p1 = scmp.lt.s32.totalorder %s3026_s27, %s3026_s27 }
0x13ac   : > { %p3028_p12 = pnand %p3027_p10, %p2826_p11  ;;  %p3035_p5 = por %p3034_p1, %p3033_p0 }
0x13ae   : > { %p3029_p13 = pneg %p3028_p12 }
0x13b0   : > { %p3036_p2 = pnand %p3035_p5, %p3029_p13 }
0x13b2   : > { %3039 = shalt.err (!%p3036_p2)
}
0x13b3   : > { %s3040_s28 = scalar_lea.hbm %s3674_s9, 256 }
0x13b4   : > { %p3041_p8 = scmp.ne.s32.totalorder %s3674_s9, %s3040_s28  ;;  %p3046_p7 = scmp.lt.u32.totalorder %s3040_s28, %s3674_s9 }
0x13b6   : > { %p3042_p3 = pnand %p3041_p8, %p2826_p11 }
0x13b8   : > { %p3043_p4 = pneg %p3042_p3 }
0x13ba   : > { %p3048_p9 = pnand %p3046_p7, %p3043_p4 }
0x13bc   : > { %3051 = shalt.err (!%p3048_p9)
}
0x13bd   : > { %2799 = dma.vmem_to_hbm [thread:$0]  (%p2826_p11), %s2246_s15, 256, %s3674_s9, [#allocation5], %s3118_s19, %s3118_s19, %s3119_s26  }
0x13be   : > { %s3120_s21 = smov [#allocation12]  }
0x13bf   : > { %s2271_s25 = sshll.u32 %s3120_s21, 4  ;;  %s2272_s25 = int_to_ptr.vmem [resolvable:$true] %s2271_s25 }
0x13c0   : > { %s3052_s13 = scalar_lea.vmem %s2272_s25, 256  ;;  %p3059_p13 = scmp.lt.s32.totalorder %s2272_s25, %s2272_s25 }
0x13c1   : > { %p3053_p6 = scmp.ne.s32.totalorder %s2272_s25, %s3052_s13  ;;  %p3060_p0 = scmp.lt.s32.totalorder %s3052_s13, %s3052_s13 }
0x13c3   : > { %p3054_p10 = pnand %p3053_p6, %p2826_p11  ;;  %p3061_p1 = por %p3060_p0, %p3059_p13 }
0x13c5   : > { %p3055_p12 = pneg %p3054_p10 }
0x13c7   : > { %p3062_p5 = pnand %p3061_p1, %p3055_p12 }
0x13c9   : > { %3065 = shalt.err (!%p3062_p5)
}
0x13ca   : > { %s3066_s29 = scalar_lea.hbm %s3676_s11, 256 }
0x13cb   : > { %p3067_p2 = scmp.ne.s32.totalorder %s3676_s11, %s3066_s29  ;;  %p3072_p4 = scmp.lt.u32.totalorder %s3066_s29, %s3676_s11 }
0x13cd   : > { %p3068_p8 = pnand %p3067_p2, %p2826_p11 }
0x13cf   : > { %p3069_p3 = pneg %p3068_p8 }
0x13d1   : > { %p3074_p7 = pnand %p3072_p4, %p3069_p3 }
0x13d3   : > { %3077 = shalt.err (!%p3074_p7)
}
0x13d4   : > { %2803 = dma.vmem_to_hbm [thread:$0]  (%p2826_p11), %s2272_s25, 256, %s3676_s11, [#allocation11], %s3118_s19, %s3118_s19, %s3119_s26  }
0x13d5   : > { %3091 = dma.done.wait (%p2826_p11), [#allocation5], 256  }
0x13d6   : > { %3093 = vsyncadd (%p2826_p11), [#allocation5], 4294967040 }
0x13d7   : > { %3095 = dma.done.wait (%p2826_p11), [#allocation11], 512  }
0x13d8   : > { %3097 = vsyncadd (%p2826_p11), [#allocation11], 4294966784 }
0x13d9 PF: > { %s26_s17 = sadd.s32 1, %s3100_s17  }
0x13da   : > { %p23_p9 = scmp.ge.s32.totalorder %s26_s17, 4  }
0x13dc   :  { %25 = sbr.rel (!%p23_p9) target bundleno = 4 (0x4), region = 161 }
0x13e3   :  { %2295 = vsyncpa [#allocation4], 1 }
0x13e4   :  { %2297 = vsyncpa [#allocation4 + $0x1], 1 }
0x13e5   :  { %2298 = vsyncpa [#allocation7], 1 }
0x13e6   :  { %2299 = vsyncpa [#allocation5], 1 }
0x13e7   :  { %2301 = vsyncpa [#allocation5 + $0x1], 1 }
0x13e8   :  { %2302 = vsyncpa [#allocation11], 1 }

</bundles_post_ra>
